<compile_context>
chip_gen: v7x
topology: tpu7x:2x2x1
jax: 0.10.0
libtpu: 0.0.40
codegen_flags: <defaults>
</compile_context>

<pallas_src>
import functools
import numpy as np
import jax
import jax.numpy as jnp
from jax.experimental import pallas as pl
from jax.experimental.pallas import tpu as pltpu


def _deform_attn_kernel(xl_ref, img_ref, w_ref, b_ref, out_ref, off_ref, *, H, W):
    L = H * W

    xl = xl_ref[0]                # (1, L) flattened image (conv input)
    img = img_ref[0]              # (H, W) image (sampling source)
    w = w_ref[...]                # (Cq, 3) conv weights
    b = b_ref[...]                # (Cq, 1) conv bias

    # ---- Conv1d(1, Cq, kernel=3, pad=1): taps built in-kernel (roll-MAC) ----
    lane = jax.lax.broadcasted_iota(jnp.int32, (1, L), 1)
    x_prev = jnp.where(lane == 0, 0.0, pltpu.roll(xl, shift=1, axis=1))          # x[j-1], zero pad
    x_next = jnp.where(lane == L - 1, 0.0, pltpu.roll(xl, shift=L - 1, axis=1))  # x[j+1], zero pad
    Qc = (w[:, 0:1] * x_prev + w[:, 1:2] * xl + w[:, 2:3] * x_next + b)          # (Cq, L) lane-dense
    off_ref[0] = Qc.astype(off_ref.dtype)                                        # offset = Q (channel-major)

    # ---- grid_sample(bilinear, align_corners=True, zeros) on Q[..., (1, 0)], separable ----
    gx = Qc[1:2, :]                                                              # (1, L) x (width) coord
    gy = Qc[0:1, :]                                                              # (1, L) y (height) coord
    ix = (gx + 1.0) * 0.5 * (W - 1)
    iy = (gy + 1.0) * 0.5 * (H - 1)
    ix0f = jnp.floor(ix)
    iy0f = jnp.floor(iy)
    fx = ix - ix0f
    fy = iy - iy0f
    ix0 = ix0f.astype(jnp.int32)
    iy0 = iy0f.astype(jnp.int32)

    # Separable bilinear weights; out-of-bounds corners vanish because the iota compare
    # over r in [0,H) / c in [0,W) never matches (= zeros padding_mode).
    r_iota = jax.lax.broadcasted_iota(jnp.int32, (H, L), 0)
    c_iota = jax.lax.broadcasted_iota(jnp.int32, (W, L), 0)
    Wy = ((r_iota == iy0).astype(jnp.float32) * (1.0 - fy)
          + (r_iota == iy0 + 1).astype(jnp.float32) * fy)                        # (H, L)
    Wx = ((c_iota == ix0).astype(jnp.float32) * (1.0 - fx)
          + (c_iota == ix0 + 1).astype(jnp.float32) * fx)                        # (W, L)

    # x_sampled[n] = sum_{r,c} img[r,c] * Wy[r,n] * Wx[c,n]
    T = jax.lax.dot_general(img, Wy, (((0,), (0,)), ((), ())),
                            preferred_element_type=jnp.float32)                  # (W, L) on MXU
    xs = jnp.sum(T * Wx, axis=0, keepdims=True)                                  # (1, L) lane-dense

    # ---- out = softmax(Q Q^T) @ x_sampled, fused (attn never materialized) ----
    logits = jax.lax.dot_general(Qc, Qc, (((0,), (0,)), ((), ())),
                                 preferred_element_type=jnp.float32)             # (L, L), symmetric
    # Cheap valid stabilizer (Cauchy–Schwarz): stab[m] >= max_n Q[n].Q[m]; cancels in num/denom.
    ss = jnp.sum(Qc * Qc, axis=0, keepdims=True)                                 # (1, L) = ||Q[m]||^2
    stab = jnp.sqrt(ss * jnp.max(ss, axis=1, keepdims=True))                     # (1, L)
    # bf16 exp (bf16 EUP on v6e/v7x; f32 fallback on v5e) and bf16 MXU operand; f32 accumulation.
    e = jnp.exp((logits - stab).astype(jnp.bfloat16))                            # (L, L) bf16; e[n,m]
    xs1 = jnp.concatenate([xs, jnp.ones_like(xs)], axis=0).astype(jnp.bfloat16)  # (2, L): [xs; 1]
    nd = jax.lax.dot_general(xs1, e, (((1,), (0,)), ((), ())),
                             preferred_element_type=jnp.float32)                 # (2, L): [num; denom]
    # TODO(synk): masked_fill / attn_drop paths omitted (mask=None, attn_drop undefined in module).
    out_ref[0] = (nd[0:1, :] * pl.reciprocal(nd[1:2, :], approx=True)).astype(out_ref.dtype)


def deformable_attention(x, w_conv, b_conv):
    """x: (B, 1, H, W) f32; w_conv: (2*offset_dim, 3); b_conv: (2*offset_dim,)."""
    B, C, H, W = x.shape
    assert C == 1, "Conv1d(in_channels=1) implies C == 1"
    L = H * W
    Cq = w_conv.shape[0]

    xl = x.reshape(B, 1, L).astype(jnp.float32)       # flattened conv input (no im2col staging)
    ximg = x[:, 0].astype(jnp.float32)                # (B, H, W) sampling source (no transpose)
    bcol = b_conv.reshape(Cq, 1).astype(jnp.float32)

    kernel = functools.partial(_deform_attn_kernel, H=H, W=W)
    out_cl, off_cl = pl.pallas_call(
        kernel,
        out_shape=(jax.ShapeDtypeStruct((B, 1, L), jnp.float32),
                   jax.ShapeDtypeStruct((B, Cq, L), jnp.float32)),
        grid=(B,),
        in_specs=[
            pl.BlockSpec((1, 1, L), lambda b: (b, 0, 0)),
            pl.BlockSpec((1, H, W), lambda b: (b, 0, 0)),
            pl.BlockSpec((Cq, 3), lambda b: (0, 0)),
            pl.BlockSpec((Cq, 1), lambda b: (0, 0)),
        ],
        out_specs=(pl.BlockSpec((1, 1, L), lambda b: (b, 0, 0)),
                   pl.BlockSpec((1, Cq, L), lambda b: (b, 0, 0))),
        # grid=(B,) marked parallel so the two TensorCores on v7x each take one batch.
        compiler_params=pltpu.CompilerParams(dimension_semantics=("parallel",)),
    )(xl, ximg, w_conv.astype(jnp.float32), bcol)

    # Lane-dense kernel layouts -> module layouts (re-layout done in XLA, not in-kernel).
    out = jnp.transpose(out_cl, (0, 2, 1))        # (B, L, C=1)
    offset = jnp.transpose(off_cl, (0, 2, 1))     # (B, L, Cq) == Q
    return out, offset


def reference(x, w_conv, b_conv):
    """Pure-JAX reference with identical semantics (for verification)."""
    B, C, H, W = x.shape
    L = H * W
    xl = x.reshape(B, L)
    xpad = jnp.pad(xl, ((0, 0), (1, 1)))
    x0 = xpad[:, None, 0:L]
    x1 = xpad[:, None, 1:L + 1]
    x2 = xpad[:, None, 2:L + 2]
    Qc = (w_conv[None, :, 0:1] * x0 + w_conv[None, :, 1:2] * x1
          + w_conv[None, :, 2:3] * x2 + b_conv[None, :, None])      # (B, Cq, L)
    Q = jnp.transpose(Qc, (0, 2, 1))                                 # (B, L, Cq)
    gx = Q[..., 1]
    gy = Q[..., 0]
    ix = (gx + 1.0) * 0.5 * (W - 1)
    iy = (gy + 1.0) * 0.5 * (H - 1)
    ix0 = jnp.floor(ix)
    iy0 = jnp.floor(iy)
    fx = ix - ix0
    fy = iy - iy0
    img = x[:, 0].reshape(B, L)

    def samp(iyc, ixc):
        iyi = iyc.astype(jnp.int32)
        ixi = ixc.astype(jnp.int32)
        valid = ((ixi >= 0) & (ixi < W) & (iyi >= 0) & (iyi < H)).astype(x.dtype)
        flat = jnp.clip(iyi, 0, H - 1) * W + jnp.clip(ixi, 0, W - 1)
        return jnp.take_along_axis(img, flat, axis=1) * valid

    xs = ((1 - fx) * (1 - fy) * samp(iy0, ix0) + fx * (1 - fy) * samp(iy0, ix0 + 1)
          + (1 - fx) * fy * samp(iy0 + 1, ix0) + fx * fy * samp(iy0 + 1, ix0 + 1))  # (B, L)
    logits = jnp.einsum('bmc,bnc->bmn', Q, Q)
    attn = jax.nn.softmax(logits, axis=-1)
    out = jnp.einsum('bmn,bn->bm', attn, xs)[..., None]              # (B, L, 1)
    return out, Q


if __name__ == "__main__":
    key = jax.random.PRNGKey(0)
    k1, k2, k3 = jax.random.split(key, 3)
    B, C, H, W = 2, 1, 16, 16
    offset_dim = 4
    Cq = 2 * offset_dim

    x = jax.random.normal(k1, (B, C, H, W), dtype=jnp.float32)
    w_conv = jax.random.uniform(k2, (Cq, 3), minval=-0.3, maxval=0.3, dtype=jnp.float32)
    b_conv = jax.random.uniform(k3, (Cq,), minval=-0.1, maxval=0.1, dtype=jnp.float32)

    out, offset = deformable_attention(x, w_conv, b_conv)
    jax.block_until_ready((out, offset))

    out_ref, off_ref = reference(x, w_conv, b_conv)
    np.testing.assert_allclose(np.asarray(offset), np.asarray(off_ref), rtol=2e-3, atol=2e-3)
    np.testing.assert_allclose(np.asarray(out), np.asarray(out_ref), rtol=2e-3, atol=2e-3)
    print("KERNEL_OK")
</pallas_src>

<mosaic_0001>
module attributes {stable_mosaic.version = 11 : i64} {
  func.func @_deform_attn_kernel(%arg0: i32, %arg1: memref<1x1x256xf32, #tpu.memory_space<vmem>>, %arg2: memref<1x16x16xf32, #tpu.memory_space<vmem>>, %arg3: memref<8x3xf32, #tpu.memory_space<vmem>>, %arg4: memref<8x1xf32, #tpu.memory_space<vmem>>, %arg5: memref<1x1x256xf32, #tpu.memory_space<vmem>>, %arg6: memref<1x8x256xf32, #tpu.memory_space<vmem>>) attributes {dimension_semantics = [#tpu.dimension_semantics<parallel>], iteration_bounds = array<i64: 2>, scalar_prefetch = 0 : i64, scratch_operands = 0 : i64, tpu.core_type = #tpu.core_type<tc>, window_params = [{transform_indices = @transform_0, window_bounds = array<i64: 1, 1, 256>}, {transform_indices = @transform_1, window_bounds = array<i64: 1, 16, 16>}, {pipeline_mode = #tpu.pipeline_mode<synchronous>, transform_indices = @transform_2, window_bounds = array<i64: 8, 3>}, {pipeline_mode = #tpu.pipeline_mode<synchronous>, transform_indices = @transform_3, window_bounds = array<i64: 8, 1>}, {transform_indices = @transform_4, window_bounds = array<i64: 1, 1, 256>}, {transform_indices = @transform_5, window_bounds = array<i64: 1, 8, 256>}]} {
    %c0 = arith.constant 0 : index
    %c0_0 = arith.constant 0 : index
    %c0_1 = arith.constant 0 : index
    %0 = vector.load %arg1[%c0, %c0_0, %c0_1] : memref<1x1x256xf32, #tpu.memory_space<vmem>>, vector<1x1x256xf32>
    %1 = vector.shape_cast %0 : vector<1x1x256xf32> to vector<1x256xf32>
    %c0_2 = arith.constant 0 : index
    %c0_3 = arith.constant 0 : index
    %c0_4 = arith.constant 0 : index
    %2 = vector.load %arg2[%c0_2, %c0_3, %c0_4] : memref<1x16x16xf32, #tpu.memory_space<vmem>>, vector<1x16x16xf32>
    %3 = vector.shape_cast %2 : vector<1x16x16xf32> to vector<16x16xf32>
    %c0_5 = arith.constant 0 : index
    %c0_6 = arith.constant 0 : index
    %4 = vector.load %arg3[%c0_5, %c0_6] : memref<8x3xf32, #tpu.memory_space<vmem>>, vector<8x3xf32>
    %c0_7 = arith.constant 0 : index
    %c0_8 = arith.constant 0 : index
    %5 = vector.load %arg4[%c0_7, %c0_8] : memref<8x1xf32, #tpu.memory_space<vmem>>, vector<8x1xf32>
    %6 = tpu.iota {dimensions = array<i32: 1>} : vector<1x256xi32>
    %c0_i32 = arith.constant 0 : i32
    %7 = vector.broadcast %c0_i32 : i32 to vector<1x256xi32>
    %8 = arith.cmpi eq, %6, %7 : vector<1x256xi32>
    %c1_i32 = arith.constant 1 : i32
    %9 = tpu.dynamic_rotate %1 by %c1_i32 dim 1 : vector<1x256xf32>, i32 -> vector<1x256xf32>
    %cst = arith.constant 0.000000e+00 : f32
    %10 = vector.broadcast %cst : f32 to vector<1x256xf32>
    %11 = arith.select %8, %10, %9 : vector<1x256xi1>, vector<1x256xf32>
    %c255_i32 = arith.constant 255 : i32
    %12 = vector.broadcast %c255_i32 : i32 to vector<1x256xi32>
    %13 = arith.cmpi eq, %6, %12 : vector<1x256xi32>
    %c255_i32_9 = arith.constant 255 : i32
    %14 = tpu.dynamic_rotate %1 by %c255_i32_9 dim 1 : vector<1x256xf32>, i32 -> vector<1x256xf32>
    %cst_10 = arith.constant 0.000000e+00 : f32
    %15 = vector.broadcast %cst_10 : f32 to vector<1x256xf32>
    %16 = arith.select %13, %15, %14 : vector<1x256xi1>, vector<1x256xf32>
    %17 = vector.extract_strided_slice %4 {offsets = [0, 0], sizes = [8, 1], strides = [1, 1]} : vector<8x3xf32> to vector<8x1xf32>
    %18 = vector.broadcast %17 : vector<8x1xf32> to vector<8x256xf32>
    %19 = vector.broadcast %11 : vector<1x256xf32> to vector<8x256xf32>
    %20 = arith.mulf %18, %19 : vector<8x256xf32>
    %21 = vector.extract_strided_slice %4 {offsets = [0, 1], sizes = [8, 1], strides = [1, 1]} : vector<8x3xf32> to vector<8x1xf32>
    %22 = vector.broadcast %21 : vector<8x1xf32> to vector<8x256xf32>
    %23 = vector.broadcast %1 : vector<1x256xf32> to vector<8x256xf32>
    %24 = arith.mulf %22, %23 : vector<8x256xf32>
    %25 = arith.addf %20, %24 : vector<8x256xf32>
    %26 = vector.extract_strided_slice %4 {offsets = [0, 2], sizes = [8, 1], strides = [1, 1]} : vector<8x3xf32> to vector<8x1xf32>
    %27 = vector.broadcast %26 : vector<8x1xf32> to vector<8x256xf32>
    %28 = vector.broadcast %16 : vector<1x256xf32> to vector<8x256xf32>
    %29 = arith.mulf %27, %28 : vector<8x256xf32>
    %30 = arith.addf %25, %29 : vector<8x256xf32>
    %31 = vector.broadcast %5 : vector<8x1xf32> to vector<8x256xf32>
    %32 = arith.addf %30, %31 : vector<8x256xf32>
    %c0_11 = arith.constant 0 : index
    %c0_12 = arith.constant 0 : index
    %c0_13 = arith.constant 0 : index
    %33 = vector.load %arg6[%c0_11, %c0_12, %c0_13] : memref<1x8x256xf32, #tpu.memory_space<vmem>>, vector<1x8x256xf32>
    %34 = vector.shape_cast %33 : vector<1x8x256xf32> to vector<8x256xf32>
    %35 = vector.shape_cast %32 : vector<8x256xf32> to vector<1x8x256xf32>
    tpu.vector_store %arg6[%c0_11, %c0_12, %c0_13], %35 {strides = array<i32>} : memref<1x8x256xf32, #tpu.memory_space<vmem>>, vector<1x8x256xf32>,
    %36 = vector.extract_strided_slice %32 {offsets = [1, 0], sizes = [1, 256], strides = [1, 1]} : vector<8x256xf32> to vector<1x256xf32>
    %37 = vector.extract_strided_slice %32 {offsets = [0, 0], sizes = [1, 256], strides = [1, 1]} : vector<8x256xf32> to vector<1x256xf32>
    %cst_14 = arith.constant 1.000000e+00 : f32
    %38 = vector.broadcast %cst_14 : f32 to vector<1x256xf32>
    %39 = arith.addf %36, %38 : vector<1x256xf32>
    %cst_15 = arith.constant 5.000000e-01 : f32
    %40 = vector.broadcast %cst_15 : f32 to vector<1x256xf32>
    %41 = arith.mulf %39, %40 : vector<1x256xf32>
    %cst_16 = arith.constant 1.500000e+01 : f32
    %42 = vector.broadcast %cst_16 : f32 to vector<1x256xf32>
    %43 = arith.mulf %41, %42 : vector<1x256xf32>
    %cst_17 = arith.constant 1.000000e+00 : f32
    %44 = vector.broadcast %cst_17 : f32 to vector<1x256xf32>
    %45 = arith.addf %37, %44 : vector<1x256xf32>
    %cst_18 = arith.constant 5.000000e-01 : f32
    %46 = vector.broadcast %cst_18 : f32 to vector<1x256xf32>
    %47 = arith.mulf %45, %46 : vector<1x256xf32>
    %cst_19 = arith.constant 1.500000e+01 : f32
    %48 = vector.broadcast %cst_19 : f32 to vector<1x256xf32>
    %49 = arith.mulf %47, %48 : vector<1x256xf32>
    %50 = math.floor %43 : vector<1x256xf32>
    %51 = math.floor %49 : vector<1x256xf32>
    %52 = arith.subf %43, %50 : vector<1x256xf32>
    %53 = arith.subf %49, %51 : vector<1x256xf32>
    %54 = arith.fptosi %50 : vector<1x256xf32> to vector<1x256xi32>
    %55 = arith.fptosi %51 : vector<1x256xf32> to vector<1x256xi32>
    %56 = tpu.iota {dimensions = array<i32: 0>} : vector<16x256xi32>
    %57 = tpu.iota {dimensions = array<i32: 0>} : vector<16x256xi32>
    %58 = vector.broadcast %55 : vector<1x256xi32> to vector<16x256xi32>
    %59 = arith.cmpi eq, %56, %58 : vector<16x256xi32>
    %60 = arith.extui %59 : vector<16x256xi1> to vector<16x256xi32>
    %61 = arith.sitofp %60 : vector<16x256xi32> to vector<16x256xf32>
    %cst_20 = arith.constant 1.000000e+00 : f32
    %62 = vector.broadcast %cst_20 : f32 to vector<1x256xf32>
    %63 = arith.subf %62, %53 : vector<1x256xf32>
    %64 = vector.broadcast %63 : vector<1x256xf32> to vector<16x256xf32>
    %65 = arith.mulf %61, %64 : vector<16x256xf32>
    %c1_i32_21 = arith.constant 1 : i32
    %66 = vector.broadcast %c1_i32_21 : i32 to vector<1x256xi32>
    %67 = arith.addi %55, %66 : vector<1x256xi32>
    %68 = vector.broadcast %67 : vector<1x256xi32> to vector<16x256xi32>
    %69 = arith.cmpi eq, %56, %68 : vector<16x256xi32>
    %70 = arith.extui %69 : vector<16x256xi1> to vector<16x256xi32>
    %71 = arith.sitofp %70 : vector<16x256xi32> to vector<16x256xf32>
    %72 = vector.broadcast %53 : vector<1x256xf32> to vector<16x256xf32>
    %73 = arith.mulf %71, %72 : vector<16x256xf32>
    %74 = arith.addf %65, %73 : vector<16x256xf32>
    %75 = vector.broadcast %54 : vector<1x256xi32> to vector<16x256xi32>
    %76 = arith.cmpi eq, %57, %75 : vector<16x256xi32>
    %77 = arith.extui %76 : vector<16x256xi1> to vector<16x256xi32>
    %78 = arith.sitofp %77 : vector<16x256xi32> to vector<16x256xf32>
    %cst_22 = arith.constant 1.000000e+00 : f32
    %79 = vector.broadcast %cst_22 : f32 to vector<1x256xf32>
    %80 = arith.subf %79, %52 : vector<1x256xf32>
    %81 = vector.broadcast %80 : vector<1x256xf32> to vector<16x256xf32>
    %82 = arith.mulf %78, %81 : vector<16x256xf32>
    %c1_i32_23 = arith.constant 1 : i32
    %83 = vector.broadcast %c1_i32_23 : i32 to vector<1x256xi32>
    %84 = arith.addi %54, %83 : vector<1x256xi32>
    %85 = vector.broadcast %84 : vector<1x256xi32> to vector<16x256xi32>
    %86 = arith.cmpi eq, %57, %85 : vector<16x256xi32>
    %87 = arith.extui %86 : vector<16x256xi1> to vector<16x256xi32>
    %88 = arith.sitofp %87 : vector<16x256xi32> to vector<16x256xf32>
    %89 = vector.broadcast %52 : vector<1x256xf32> to vector<16x256xf32>
    %90 = arith.mulf %88, %89 : vector<16x256xf32>
    %91 = arith.addf %82, %90 : vector<16x256xf32>
    %cst_24 = arith.constant dense<0.000000e+00> : vector<16x256xf32>
    %92 = tpu.matmul %3, %74, %cst_24 {dimension_numbers = #tpu.dot_dimension_numbers<[0], [0], [1], [1], [0, 1, 1, 1], [], []>} : vector<16x16xf32>, vector<16x256xf32>, vector<16x256xf32> -> vector<16x256xf32>
    %93 = arith.mulf %92, %91 : vector<16x256xf32>
    %cst_25 = arith.constant dense<0.000000e+00> : vector<256xf32>
    %94 = vector.multi_reduction <add>, %93, %cst_25 [0] : vector<16x256xf32> to vector<256xf32>
    %95 = vector.shape_cast %94 : vector<256xf32> to vector<1x256xf32>
    %cst_26 = arith.constant dense<0.000000e+00> : vector<256x256xf32>
    %96 = tpu.matmul %32, %32, %cst_26 {dimension_numbers = #tpu.dot_dimension_numbers<[0], [0], [1], [1], [0, 1, 1, 1], [], []>} : vector<8x256xf32>, vector<8x256xf32>, vector<256x256xf32> -> vector<256x256xf32>
    %97 = arith.mulf %32, %32 : vector<8x256xf32>
    %cst_27 = arith.constant dense<0.000000e+00> : vector<256xf32>
    %98 = vector.multi_reduction <add>, %97, %cst_27 [0] : vector<8x256xf32> to vector<256xf32>
    %99 = vector.shape_cast %98 : vector<256xf32> to vector<1x256xf32>
    %cst_28 = arith.constant dense<0xFF800000> : vector<1xf32>
    %100 = vector.multi_reduction <maximumf>, %99, %cst_28 [1] : vector<1x256xf32> to vector<1xf32>
    %101 = vector.shape_cast %100 : vector<1xf32> to vector<1x1xf32>
    %102 = vector.broadcast %101 : vector<1x1xf32> to vector<1x256xf32>
    %103 = arith.mulf %99, %102 : vector<1x256xf32>
    %104 = math.sqrt %103 : vector<1x256xf32>
    %105 = vector.broadcast %104 : vector<1x256xf32> to vector<256x256xf32>
    %106 = arith.subf %96, %105 : vector<256x256xf32>
    %107 = arith.truncf %106 : vector<256x256xf32> to vector<256x256xbf16>
    %108 = math.exp %107 : vector<256x256xbf16>
    %cst_29 = arith.constant 1.000000e+00 : f32
    %109 = vector.broadcast %cst_29 : f32 to vector<1x256xf32>
    %110 = tpu.concatenate %95, %109 in 0 : vector<1x256xf32>, vector<1x256xf32> -> vector<2x256xf32>
    %111 = arith.truncf %110 : vector<2x256xf32> to vector<2x256xbf16>
    %cst_30 = arith.constant dense<0.000000e+00> : vector<2x256xf32>
    %112 = tpu.matmul %111, %108, %cst_30 {dimension_numbers = #tpu.dot_dimension_numbers<[1], [0], [0], [1], [0, 0, 1, 1], [], []>} : vector<2x256xbf16>, vector<256x256xbf16>, vector<2x256xf32> -> vector<2x256xf32>
    %113 = vector.extract_strided_slice %112 {offsets = [0, 0], sizes = [1, 256], strides = [1, 1]} : vector<2x256xf32> to vector<1x256xf32>
    %114 = vector.extract_strided_slice %112 {offsets = [1, 0], sizes = [1, 256], strides = [1, 1]} : vector<2x256xf32> to vector<1x256xf32>
    %115 = tpu.reciprocal %114 {approx = true} : vector<1x256xf32> -> vector<1x256xf32>
    %116 = arith.mulf %113, %115 : vector<1x256xf32>
    %c0_31 = arith.constant 0 : index
    %c0_32 = arith.constant 0 : index
    %c0_33 = arith.constant 0 : index
    %117 = vector.load %arg5[%c0_31, %c0_32, %c0_33] : memref<1x1x256xf32, #tpu.memory_space<vmem>>, vector<1x1x256xf32>
    %118 = vector.shape_cast %117 : vector<1x1x256xf32> to vector<1x256xf32>
    %119 = vector.shape_cast %116 : vector<1x256xf32> to vector<1x1x256xf32>
    tpu.vector_store %arg5[%c0_31, %c0_32, %c0_33], %119 {strides = array<i32>} : memref<1x1x256xf32, #tpu.memory_space<vmem>>, vector<1x1x256xf32>,
    return
  }
  func.func @transform_0(%arg0: i32) -> (i32, i32, i32) {
    %c0_i32 = arith.constant 0 : i32
    %c0_i32_0 = arith.constant 0 : i32
    %c0_i32_1 = arith.constant 0 : i32
    return %arg0, %c0_i32, %c0_i32_0 : i32, i32, i32
  }
  func.func @transform_1(%arg0: i32) -> (i32, i32, i32) {
    %c0_i32 = arith.constant 0 : i32
    %c0_i32_0 = arith.constant 0 : i32
    %c0_i32_1 = arith.constant 0 : i32
    return %arg0, %c0_i32, %c0_i32_0 : i32, i32, i32
  }
  func.func @transform_2(%arg0: i32) -> (i32, i32) {
    %c0_i32 = arith.constant 0 : i32
    %c0_i32_0 = arith.constant 0 : i32
    %c0_i32_1 = arith.constant 0 : i32
    return %c0_i32, %c0_i32_0 : i32, i32
  }
  func.func @transform_3(%arg0: i32) -> (i32, i32) {
    %c0_i32 = arith.constant 0 : i32
    %c0_i32_0 = arith.constant 0 : i32
    %c0_i32_1 = arith.constant 0 : i32
    return %c0_i32, %c0_i32_0 : i32, i32
  }
  func.func @transform_4(%arg0: i32) -> (i32, i32, i32) {
    %c0_i32 = arith.constant 0 : i32
    %c0_i32_0 = arith.constant 0 : i32
    %c0_i32_1 = arith.constant 0 : i32
    return %arg0, %c0_i32, %c0_i32_0 : i32, i32, i32
  }
  func.func @transform_5(%arg0: i32) -> (i32, i32, i32) {
    %c0_i32 = arith.constant 0 : i32
    %c0_i32_0 = arith.constant 0 : i32
    %c0_i32_1 = arith.constant 0 : i32
    return %arg0, %c0_i32, %c0_i32_0 : i32, i32, i32
  }
}

</mosaic_0001>

<bundles_post_ra>
// kernel: tpu_custom_call.1
= control target key start
LH: loop header
LB: loop body
LE: loop exit
PB: predicated region body
PF: predicated region fallthrough
CT: control target
= control target key end

     0   :  { %11 = vsyncpa [#allocation3], 0  ;;  %s2373_s0 = inlined_call_operand.vmem [shape: f32[2,1,256], index: 0, kind: input, shape index: {}]   ;;  %s2374_s1 = inlined_call_operand.hbm [shape: f32[2,16,16], index: 1, kind: input, shape index: {}]   ;;  %s2375_s2 = inlined_call_operand.vmem [shape: f32[8,3], index: 2, kind: input, shape index: {}]   ;;  %s2376_s3 = inlined_call_operand.vmem [shape: f32[8,1], index: 3, kind: input, shape index: {}]   ;;  %s2377_s4 = inlined_call_operand.hbm [shape: f32[2,1,256], index: 4, kind: output, shape index: {0}]   ;;  %s2378_s5 = inlined_call_operand.hbm [shape: f32[2,8,256], index: 5, kind: output, shape index: {1}]  }
   0x1   :  { %13 = vsyncpa [#allocation3 + $0x1], 0 }
   0x2   :  { %14 = vsyncpa [#allocation4], 0 }
   0x3   :  { %16 = vsyncpa [#allocation4 + $0x1], 0 }
   0x4   :  { %17 = vsyncpa [#allocation7], 0 }
   0x5   :  { %19 = vsyncpa [#allocation7 + $0x1], 0  ;;  %s1907_s18 = smov 0   ;;  %s1909_s19 = smov 0  }
   0x6   :  { %s1911_s20 = smov 0   ;;  %s1913_s21 = smov 0  }
   0x7 LB: > { %s1928_s22 = sadd.s32 4294967295, %s1863_s21   ;;  %s1519_s23 = sadd.s32 4294967294, %s1863_s21   ;;  %s1863_s21 = sphi %s1913_s21, %s2391_s21   ;;  %s1859_s20 = sphi %s1911_s20, %s2390_s20   ;;  %s1855_s19 = sphi %s1909_s19, %s2389_s19   ;;  %s1851_s18 = sphi %s1907_s18, %s2388_s18  }
   0x8   : > { %s1932_s24 = sadd.s32 1, %s1863_s21   ;;  %s58_s25 = sadd.s32 1, %s1859_s20 }
   0x9   : > { %s55_s26 = ssub.s32 %s1863_s21, %s1932_s24  ;;  %p65_p0 = scmp.ne.s32.totalorder %s1859_s20, %s1855_s19 }
   0xa   : > { %p56_p1 = scmp.eq.s32.totalorder %s55_s26, 0  ;;  %p66_p2 = scmp.eq.s32.totalorder %s1863_s21, 0 }
   0xb   : > { %p71_p3 = scmp.ne.s32.totalorder %s1855_s19, %s1851_s18  ;;  %p72_p4 = scmp.eq.s32.totalorder %s1928_s22, 0 }
   0xc   : > { %s1944_s27 = scalar_select %p56_p1, %s1859_s20, %s58_s25  }
   0xd   : > { %p1946_p5 = por %p66_p2, %p65_p0  ;;  %p1950_p6 = por %p72_p4, %p71_p3 }
   0xe   : > { %p137_p7 = scmp.eq.s32.totalorder %s1928_s22, 1  ;;  %p143_p8 = scmp.eq.s32.totalorder %s1519_s23, 1 }
   0xf   : > { %p1616_p10 = scmp.lt.s32.totalorder %s1863_s21, 2  ;;  %s202_s7 = sand.u32 1, %s1859_s20  }
  0x10   : > { %p1957_p11 = por %p137_p7, %p65_p0  ;;  %p1961_p12 = por %p143_p8, %p71_p3 }
  0x11   : > { %s1588_s8 = sshll.u32 %s1863_s21, 8  ;;  %s1522_s9 = sshll.u32 %s202_s7, 4 }
  0x12   : > { %s2382_s30 = scalar_select %p1957_p11, 1, 0 }
  0x13   : > { %s2383_s6 = scalar_select %p1961_p12, 1, 0 }
  0x14   : > { %s1970_s12 = scalar_lea.hbm %s2374_s1, %s1588_s8  ;;  %s206_s13 = scalar_lea.vmem [#allocation2], %s1522_s9 }
  0x15   : > { %s213_s14 = sshll.u32 %s206_s13, 4  ;;  %p1974_p13 = pnand %p1616_p10, %p1946_p5  ;;  %s1978_s14 = int_to_ptr.vmem [resolvable:$true] %s213_s14 }
  0x16   : > { %s1980_s16 = scalar_lea.sflag [#allocation3], %s202_s7  ;;  %s1735_s17 = scalar_lea.hbm %s1970_s12, 256 }
  0x17   : > { %p1736_p0 = scmp.ne.s32.totalorder %s1970_s12, %s1735_s17  ;;  %p1737_p1 = pneg %p1974_p13 }
  0x18   : > { %s1740_s26 = scalar_lea.hbm %s2374_s1, 512  ;;  %p1741_p4 = scmp.lt.u32.totalorder %s1970_s12, %s2374_s1 }
  0x19   : > { %p1738_p2 = pnand %p1737_p1, %p1736_p0  ;;  %p1742_p5 = scmp.lt.u32.totalorder %s1740_s26, %s1735_s17 }
  0x1a   : > { %p1744_p8 = scmp.lt.u32.totalorder %s1735_s17, %s1970_s12 }
  0x1b   : > { %p1739_p3 = pneg %p1738_p2  ;;  %p1743_p7 = por %p1742_p5, %p1741_p4 }
  0x1d   : > { %p1745_p10 = por %p1744_p8, %p1743_p7 }
  0x1f   : > { %p1746_p9 = pnand %p1745_p10, %p1739_p3 }
  0x21   : > { %1749 = shalt.err (!%p1746_p9)
}
  0x22   : > { %s1750_s7 = scalar_lea.vmem %s1978_s14, 256  ;;  %s1865_s9 = smov [#allocation2]  }
  0x23   : > { %p1751_p0 = scmp.ne.s32.totalorder %s1978_s14, %s1750_s7  ;;  %s1755_s10 = sshll.u32 %s1865_s9, 4  ;;  %s1756_s10 = int_to_ptr.vmem [resolvable:$false] %s1755_s10 }
  0x24   : > { %s1757_s11 = scalar_lea.vmem %s1756_s10, 512  ;;  %p1758_p11 = scmp.lt.s32.totalorder %s1978_s14, %s1756_s10 }
  0x25   : > { %p1753_p2 = pnand %p1751_p0, %p1737_p1  ;;  %p1759_p4 = scmp.lt.s32.totalorder %s1757_s11, %s1750_s7 }
  0x27   : > { %p1754_p12 = pneg %p1753_p2  ;;  %p1760_p5 = por %p1759_p4, %p1758_p11 }
  0x29   : > { %p1761_p7 = pnand %p1760_p5, %p1754_p12 }
  0x2b   : > { %1764 = shalt.err (!%p1761_p7)
}
  0x2c   : > { %s1866_s13 = smov 128   ;;  %s1867_s17 = smov 8  }
  0x2d   : > { %1608 = dma.hbm_to_vmem [thread:$0]  (!%p1974_p13), %s1970_s12, 256, %s1978_s14, %s1980_s16, %s1866_s13, %s1866_s13, %s1867_s17  }
  0x2e   : > { %p1525_p9 = scmp.ge.s32.totalorder %s1863_s21, 1  ;;  %p221_p1 = scmp.lt.s32.totalorder %s1863_s21, 3 }
  0x30   : > { %p222_p3 = pnand %p1525_p9, %p221_p1 }
  0x31   : > { %s2011_s23 = sand.u32 (!%p222_p3), 1, %s1855_s19  }
  0x32   : > { %225 = sbr.rel (%p222_p3) target bundleno = 945 (0x3b1), region = 36  ;;  %s1526_s25 = sshll.u32 (!%p222_p3), %s2011_s23, 4 }
  0x33   : > { %s228_s26 = scalar_lea.sflag (!%p222_p3), [#allocation3], %s2011_s23  ;;  %s2017_s28 = scalar_lea.vmem (!%p222_p3), [#allocation2], %s1526_s25 }
  0x39   : > { %1838 = dma.done.wait (%p1950_p6), %s228_s26, 256  }
  0x3a   : > { %1840 = vsyncadd (%p1950_p6), %s228_s26, 4294967040  ;;  %p267_p11 = scmp.lt.s32.totalorder %s1928_s22, 1  ;;  %v276_v0 = vlaneseq  ;;  %v1868_v1 = vmov 2   ;;  %v1869_v2 = vmov 0   ;;  %v274_v5 = vld [vmem:[%s2375_s2] sm:$0xff]  ;;  %v1870_v9 = vmov 1  }
  0x3b   : > { %1661 = vset.pattern.permute.xlu1 %v1868_v1  ;;  %1659 = vset.pattern.permute.xlu0 %v1869_v2  ;;  %s1871_s9 = smov 1   ;;  %s1872_s10 = smov 127   ;;  %v275_v11 = vld [vmem:[%s2376_s3] sm:$0xff]  ;;  %v1873_v12 = vmov 0.0  }
  0x3c   : > { %s268_s12 = scalar_select %p267_p11, %s1928_s22, 1  ;;  %v2026_v3 = vshrl.u32 %v276_v0, 7  ;;  %336 = vperm.xlu1 %1661, %v274_v5   ;;  %314 = vperm.xlu0 %1659, %v274_v5   ;;  %v277_v15 = vand.u32 127, %v276_v0 }
  0x3d   : > { %874 = vmatprep.mubr.f32.mxu1 %v1873_v12  ;;  %618 = vmatprep.mubr.f32.mxu0 %v1873_v12  ;;  %s2060_s17 = scalar_lea.vmem [#allocation6], %s1526_s25  ;;  %s1590_s25 = sshll.u32 %s1928_s22, 8 }
  0x3e   : > { %s1529_s14 = sshll.u32 %s268_s12, 1  ;;  %v2032_v4 = vsub.s32 0, %v2026_v3  ;;  %v2038_v7 = vsub.s32 1, %v2026_v3  ;;  %vm296_vm0 = vcmp.lt.s32.totalorder %v277_v15, 1  ;;  %vm279_vm1 = vcmp.eq.s32.totalorder %v277_v15, 0  ;;  %s1405_s26 = sshll.u32 %s2060_s17, 4  ;;  %s1406_s26 = int_to_ptr.vmem [resolvable:$true] %s1405_s26 }
  0x3f   : > { %s270_s8 = scalar_lea.vmem %s2373_s0, %s1529_s14  ;;  %v278_v18 = vadd.s32 128, %v277_v15  ;;  %vm307_vm2 = vcmp.lt.s32.totalorder %v277_v15, 127  ;;  %v2071_v57 = vadd.s32 8, %v2026_v3  ;;  %s2302_s14 = scalar_lea.hbm %s2378_s5, %s1590_s25 }
  0x40   : > { %v271_v6 = vld [vmem:[%s270_s8] sm:$0x3]  ;;  %1660 = vset.pattern.permute.xlu0 %v1870_v9  ;;  %s1377_s15 = scalar_lea.sflag [#allocation7], %s2011_s23  ;;  %s1765_s16 = scalar_lea.vmem %s1406_s26, 256 }
  0x41   : > { %v285_v8 = vrot.slane %v271_v6, %v2032_v4  ;;  %v289_v10 = vrot.slane %v271_v6, %v2038_v7  ;;  %328 = vperm.xlu0 %1660, %v274_v5   ;;  %vm302_vm3 = vcmp.eq.s32.totalorder %v278_v18, 255  ;;  %p1766_p6 = scmp.ne.s32.totalorder %s1406_s26, %s1765_s16  ;;  %p2385_p12 = scmp.ne.s32.totalorder %s2382_s30, 0 }
  0x42   : > { %s1874_s8 = smov [#allocation6]  }
  0x43   : > { %292 = vrot.lane.b32.xlu1 %v285_v8, %s1871_s9  ;;  %p1767_p13 = pnand %p1766_p6, %p2385_p12  ;;  %s1769_s29 = sshll.u32 %s1874_s8, 4  ;;  %s1770_s29 = int_to_ptr.vmem [resolvable:$false] %s1769_s29 }
  0x44   : > { %s1771_s7 = scalar_lea.vmem %s1770_s29, 512  ;;  %p1772_p10 = scmp.lt.s32.totalorder %s1406_s26, %s1770_s29 }
  0x45   : > { %303 = vrot.lane.b32.xlu0 %v285_v8, %s1872_s10  ;;  %p1768_p8 = pneg %p1767_p13  ;;  %p1773_p0 = scmp.lt.s32.totalorder %s1771_s7, %s1765_s16 }
  0x46   : > { %1662 = vset.pattern.permute.xlu0 %v1869_v2 }
  0x47   : > { %294 = vrot.lane.b32.xlu1 %v289_v10, %s1871_s9  ;;  %p1774_p2 = por %p1773_p0, %p1772_p10 }
  0x49   : > { %353 = vperm.xlu0 %1662, %v275_v11   ;;  %p1775_p4 = pnand %p1774_p2, %p1768_p8 }
  0x4b   : > { %305 = vrot.lane.b32.xlu1 %v289_v10, %s1872_s10 }
  0xbb   : > { %v337_v13 = vpop.permute.xlu1 %336  ;;  %v315_v14 = vpop.permute.xlu0 %314 }
  0xbf   : > { %v293_v16 = vpop.permute.xlu1 %292 }
  0xc0   : > { %v329_v17 = vpop.permute.xlu0 %328 }
  0xc1   : > { %v331_v25 = vmul.f32 %v329_v17, %v285_v8  ;;  %v332_v34 = vmul.f32 %v329_v17, %v289_v10 }
  0xc3   : > { %v295_v19 = vpop.permute.xlu1 %294 }
  0xc4   : > { %v297_v20 = vsel %vm296_vm0, %v293_v16, %v295_v19  ;;  %v298_v21 = vsel %vm296_vm0, %v295_v19, %v293_v16  ;;  %v304_v26 = vpop.permute.xlu0 %303 }
  0xc5   : > { %v299_v22 = vsel %vm279_vm1, 0.0, %v298_v21  ;;  %v324_v23 = vrot.slane %v297_v20, %v2032_v4 }
  0xc6   : > { %v320_v24 = vrot.slane %v299_v22, %v2032_v4 }
  0xc7   : > { %v306_v27 = vpop.permute.xlu1 %305  ;;  %v326_v29 = vmul.f32 %v324_v23, %v315_v14 }
  0xc8   : > { %v325_v28 = vmul.f32 %v320_v24, %v315_v14  ;;  %v308_v30 = vsel %vm307_vm2, %v304_v26, %v306_v27  ;;  %v309_v31 = vsel %vm307_vm2, %v306_v27, %v304_v26  ;;  %v354_v38 = vpop.permute.xlu0 %353 }
  0xc9   : > { %v311_v32 = vsel %vm302_vm3, 0.0, %v309_v31  ;;  %v342_v33 = vrot.slane %v308_v30, %v2032_v4  ;;  %v334_v39 = vadd.f32 %v332_v34, %v326_v29 }
  0xca   : > { %v346_v35 = vrot.slane %v311_v32, %v2032_v4  ;;  %v333_v36 = vadd.f32 %v331_v25, %v325_v28 }
  0xcb   : > { %v347_v37 = vmul.f32 %v342_v33, %v337_v13 }
  0xcc   : > { %v348_v40 = vmul.f32 %v346_v35, %v337_v13 }
  0xcd   : > { %v349_v41 = vadd.f32 %v347_v37, %v333_v36 }
  0xce   : > { %v350_v42 = vadd.f32 %v348_v40, %v334_v39 }
  0xcf   : > { %v2052_v43 = vadd.f32 %v354_v38, %v349_v41 }
  0xd0   : > { %v2054_v44 = vadd.f32 %v354_v38, %v350_v42 }
  0xd1   : > { %v360_v45 = vadd.f32 1.0, %v2052_v43  ;;  %649 = vxpose.xlu1.b32.start.end [1/1] (short) %v2052_v43, 128  ;;  %358 = vst [vmem:[%s2060_s17] sm:$0xff] %v2052_v43 }
  0xd2   : > { %681 = vxpose.xlu0.b32.start.end [1/1] (short) %v2054_v44, 128  ;;  %810 = vmatprep.subr.mxu1 %v2054_v44  ;;  %v361_v46 = vadd.f32 1.0, %v2054_v44  ;;  %359 = vst [vmem:[%s2060_s17 + $0x8] sm:$0xff] %v2054_v44 }
  0xd3   : > { %811 = vmatpush1.msra.mxu1 %v2052_v43  ;;  %v362_v47 = vmul.f32 0.5, %v360_v45 }
  0xd4   : > { %v363_v48 = vmul.f32 0.5, %v361_v46 }
  0xd5   : > { %v364_v49 = vmul.f32 15.0, %v362_v47 }
  0xd6   : > { %v365_v50 = vmul.f32 15.0, %v363_v48 }
  0xd7   : > { %v366_v51 = vfloor.f32 %v364_v49 }
  0xd8   : > { %v367_v52 = vfloor.f32 %v365_v50 }
  0xd9   : > { %v368_v53 = vsub.f32 %v364_v49, %v366_v51  ;;  %v1595_v54 = vtrunc.f32 %v366_v51 }
  0xda   : > { %v369_v55 = vsub.f32 %v365_v50, %v367_v52  ;;  %v1597_v56 = vtrunc.f32 %v367_v52 }
  0xdb   : > { %v1596_v58 = vcvt.f32.s32 %v1595_v54  ;;  %v395_v59 = vsub.f32 1.0, %v368_v53  ;;  %v434_v1 = vrot.slane %v368_v53, %v2032_v4  ;;  %v502_v35 = vrot.slane %v368_v53, %v2038_v7 }
  0xdc   : > { %v1598_v60 = vcvt.f32.s32 %v1597_v56  ;;  %v396_v61 = vsub.f32 1.0, %v369_v55  ;;  %v438_v6 = vrot.slane %v369_v55, %v2032_v4  ;;  %v506_v42 = vrot.slane %v369_v55, %v2038_v7 }
  0xdd   : > { %v378_v62 = vrot.slane %v1596_v58, %v2032_v4  ;;  %v409_v63 = vadd.s32 1, %v1596_v58  ;;  %v400_v8 = vrot.slane %v395_v59, %v2032_v4  ;;  %v450_v17 = vrot.slane %v1596_v58, %v2038_v7 }
  0xde   : > { %v382_v2 = vrot.slane %v1598_v60, %v2032_v4  ;;  %v410_v5 = vadd.s32 1, %v1598_v60  ;;  %v404_v9 = vrot.slane %v396_v61, %v2032_v4  ;;  %v470_v33 = vrot.slane %v395_v59, %v2038_v7 }
  0xdf   : > { %vm383_vm4 = vcmp.eq.s32.totalorder %v2026_v3, %v378_v62  ;;  %vm385_vm5 = vcmp.eq.s32.totalorder %v2071_v57, %v378_v62  ;;  %v414_v10 = vrot.slane %v409_v63, %v2032_v4  ;;  %vm455_vm12 = vcmp.eq.s32.totalorder %v2026_v3, %v450_v17 }
  0xe0   : > { %vm384_vm6 = vcmp.eq.s32.totalorder %v2026_v3, %v382_v2  ;;  %vm386_vm7 = vcmp.eq.s32.totalorder %v2071_v57, %v382_v2  ;;  %v418_v11 = vrot.slane %v410_v5, %v2032_v4  ;;  %v1530_v13 = vsel %vm383_vm4, 1.0, %v1873_v12  ;;  %v273_v2 = vld [vmem:[%s2017_s28 + $0x8] sm:$0xff] }
  0xe1   : > { %v1531_v14 = vsel %vm384_vm6, 1.0, %v1873_v12  ;;  %v1533_v15 = vsel %vm386_vm7, 1.0, %v1873_v12  ;;  %v1532_v16 = vsel %vm385_vm5, 1.0, %v1873_v12  ;;  %v405_v19 = vmul.f32 %v1530_v13, %v400_v8 }
  0xe2   : > { %v406_v18 = vmul.f32 %v1531_v14, %v404_v9  ;;  %vm420_vm8 = vcmp.eq.s32.totalorder %v2026_v3, %v418_v11  ;;  %vm422_vm9 = vcmp.eq.s32.totalorder %v2071_v57, %v418_v11  ;;  %v408_v20 = vmul.f32 %v1533_v15, %v404_v9 }
  0xe3   : > { %v1535_v21 = vsel %vm420_vm8, 1.0, %v1873_v12  ;;  %v1537_v4 = vsel %vm422_vm9, 1.0, %v1873_v12  ;;  %vm419_vm10 = vcmp.eq.s32.totalorder %v2026_v3, %v414_v10  ;;  %vm421_vm11 = vcmp.eq.s32.totalorder %v2071_v57, %v414_v10 }
  0xe4   : > { %v440_v22 = vmul.f32 %v1535_v21, %v438_v6  ;;  %v442_v23 = vmul.f32 %v1537_v4, %v438_v6  ;;  %v1534_v24 = vsel %vm419_vm10, 1.0, %v1873_v12  ;;  %v407_v25 = vmul.f32 %v1532_v16, %v400_v8 }
  0xe5   : > { %v1536_v26 = vsel %vm421_vm11, 1.0, %v1873_v12  ;;  %v439_v27 = vmul.f32 %v1534_v24, %v434_v1  ;;  %v1538_v31 = vsel %vm455_vm12, 1.0, %v1873_v12  ;;  %v482_v34 = vrot.slane %v409_v63, %v2038_v7 }
  0xe6   : > { %v444_v28 = vadd.f32 %v440_v22, %v406_v18  ;;  %v446_v29 = vadd.f32 %v442_v23, %v408_v20  ;;  %v441_v30 = vmul.f32 %v1536_v26, %v434_v1  ;;  %v454_v38 = vrot.slane %v1598_v60, %v2038_v7  ;;  %v272_v1 = vld [vmem:[%s2017_s28] sm:$0xff] }
  0xe7   : > { %v443_v32 = vadd.f32 %v439_v27, %v405_v19  ;;  %v474_v39 = vrot.slane %v396_v61, %v2038_v7  ;;  %v475_v40 = vmul.f32 %v1538_v31, %v470_v33  ;;  %vm487_vm13 = vcmp.eq.s32.totalorder %v2026_v3, %v482_v34 }
  0xe8   : > { %v1591_v36 = vpack.c.bf16 %v446_v29, %v444_v28  ;;  %v445_v37 = vadd.f32 %v441_v30, %v407_v25  ;;  %v486_v41 = vrot.slane %v410_v5, %v2038_v7  ;;  %v1542_v46 = vsel %vm487_vm13, 1.0, %v1873_v12 }
  0xe9   : > { %vm456_vm14 = vcmp.eq.s32.totalorder %v2026_v3, %v454_v38  ;;  %vm457_vm15 = vcmp.eq.s32.totalorder %v2071_v57, %v450_v17  ;;  %v507_v47 = vmul.f32 %v1542_v46, %v502_v35  ;;  %vm489_vm1 = vcmp.eq.s32.totalorder %v2071_v57, %v482_v34 }
  0xea   : > { %1592 = vmatprep.subr.bf16.mxu0 %v1591_v36  ;;  %v1593_v45 = vpack.c.bf16 %v445_v37, %v443_v32  ;;  %v1539_v48 = vsel %vm456_vm14, 1.0, %v1873_v12  ;;  %vm488_vm0 = vcmp.eq.s32.totalorder %v2026_v3, %v486_v41  ;;  %v1540_v49 = vsel %vm457_vm15, 1.0, %v1873_v12 }
  0xeb   : > { %v476_v50 = vmul.f32 %v1539_v48, %v474_v39  ;;  %v1543_v51 = vsel %vm488_vm0, 1.0, %v1873_v12  ;;  %v477_v7 = vmul.f32 %v1540_v49, %v470_v33  ;;  %v2116_v52 = vadd.f32 %v507_v47, %v475_v40 }
  0xec   : > { %1594 = vmatpush1.bf16.msra.mxu0 %v1593_v45  ;;  %v508_v53 = vmul.f32 %v1543_v51, %v506_v42  ;;  %v1544_v54 = vsel %vm489_vm1, 1.0, %v1873_v12  ;;  %vm458_vm2 = vcmp.eq.s32.totalorder %v2071_v57, %v454_v38  ;;  %vm490_vm3 = vcmp.eq.s32.totalorder %v2071_v57, %v486_v41 }
  0xed   : > { %v509_v55 = vmul.f32 %v1544_v54, %v502_v35  ;;  %v1541_v56 = vsel %vm458_vm2, 1.0, %v1873_v12  ;;  %v1545_v60 = vsel %vm490_vm3, 1.0, %v1873_v12  ;;  %v1067_v5 = vmul.f32 %v2052_v43, %v2052_v43 }
  0xee   : > { %v2122_v58 = vadd.f32 %v508_v53, %v476_v50  ;;  %v478_v59 = vmul.f32 %v1541_v56, %v474_v39  ;;  %v510_v62 = vmul.f32 %v1545_v60, %v506_v42  ;;  %v1068_v57 = vmul.f32 %v2054_v44, %v2054_v44 }
  0xef   : > { %v2125_v61 = vadd.f32 %v509_v55, %v477_v7  ;;  %v1069_v6 = vrot.slane %v1067_v5, 4  ;;  %vm713_vm4 = vcmask 64512   ;;  %vm547_vm5 = vcmask 130048  }
  0xf0   : > { %v2127_v63 = vadd.f32 %v510_v62, %v478_v59  ;;  %v1075_v8 = vrot.slane %v1068_v57, 4  ;;  %vm1292_vm10 = vcmask 1040384  }
  0xf1   : > { %v1070_v9 = vadd.f32 %v1069_v6, %v1067_v5 }
  0xf2   : > { %v1076_v10 = vadd.f32 %v1075_v8, %v1068_v57 }
  0xf3   : > { %v1071_v11 = vrot.slane %v1070_v9, 2 }
  0xf4   : > { %v1077_v13 = vrot.slane %v1076_v10, 2 }
  0xf5   : > { %v1072_v14 = vadd.f32 %v1071_v11, %v1070_v9 }
  0xf6   : > { %v1078_v15 = vadd.f32 %v1077_v13, %v1076_v10 }
  0xf7   : > { %v1073_v16 = vrot.slane %v1072_v14, 1 }
  0xf8   : > { %v1079_v17 = vrot.slane %v1078_v15, 1 }
  0xf9   : > { %v2135_v18 = vadd.f32 %v1073_v16, %v1072_v14 }
  0xfa   : > { %v2137_v19 = vadd.f32 %v1079_v17, %v1078_v15 }
  0xfc   : > { %v1081_v43 = vmax.f32 %v2135_v18, %v2137_v19 }
 0x10f   : > { %515 = vxpose.xlu0.b32.start [1/2] (short) (narrow) %v272_v1, 16 }
 0x113   : > { %516 = vxpose.xlu0.b32.end [2/2] (short) (narrow) %v273_v2, 16 }
 0x134   : > { %1082 = vmax.xlane.f32.xlu1 %v1081_v43 }
 0x151   : > { %v665_v44 = vpop.trf.xlu1 }
 0x152   : > { %v2141_v20 = vpop.trf.xlu0  ;;  %1548 = vmatmul.mubr.msk.f32.vlgmr.msra.gmra.mrb[0].mxu1 %vm713_vm4, %v665_v44 }
 0x153   : > { %880 = vmatprep.mubr.f32.mxu1 %v1873_v12 }
 0x155   : > { %v666_v21 = vpop.trf.xlu1 }
 0x156   : > { %v2145_v4 = vpop.trf.xlu0  ;;  %1549 = vmatmul.mubr.msk.f32.gmra.mrb[2].mxu1 %vm713_vm4, %v666_v21 }
 0x157   : > { %886 = vmatprep.mubr.f32.mxu1 %v1873_v12 }
 0x159   : > { %v667_v22 = vpop.trf.xlu1 }
 0x15a   : > { %v2149_v23 = vpop.trf.xlu0  ;;  %1550 = vmatmul.mubr.msk.f32.gmra.mrb[4].mxu1 %vm713_vm4, %v667_v22 }
 0x15b   : > { %892 = vmatprep.mubr.f32.mxu1 %v1873_v12 }
 0x15d   : > { %v668_v24 = vpop.trf.xlu1 }
 0x15e   : > { %v2153_v25 = vpop.trf.xlu0  ;;  %1551 = vmatmul.mubr.msk.f32.gmra.mrb[6].mxu1 %vm713_vm4, %v668_v24 }
 0x15f   : > { %898 = vmatprep.mubr.f32.mxu1 %v1873_v12 }
 0x161   : > { %v669_v26 = vpop.trf.xlu1 }
 0x162   : > { %v701_v27 = vpop.trf.xlu0  ;;  %1552 = vmatmul.mubr.msk.f32.gmra.mrb[8].mxu1 %vm713_vm4, %v669_v26 }
 0x163   : > { %904 = vmatprep.mubr.f32.mxu1 %v1873_v12 }
 0x165   : > { %v670_v28 = vpop.trf.xlu1 }
 0x166   : > { %v702_v29 = vpop.trf.xlu0  ;;  %1553 = vmatmul.mubr.msk.f32.gmra.mrb[10].mxu1 %vm713_vm4, %v670_v28 }
 0x167   : > { %910 = vmatprep.mubr.f32.mxu1 %v1873_v12 }
 0x169   : > { %v671_v30 = vpop.trf.xlu1 }
 0x16a   : > { %v703_v31 = vpop.trf.xlu0  ;;  %1554 = vmatmul.mubr.msk.f32.gmra.mrb[12].mxu1 %vm713_vm4, %v671_v30 }
 0x16b   : > { %916 = vmatprep.mubr.f32.mxu1 %v1873_v12 }
 0x16d   : > { %v672_v32 = vpop.trf.xlu1 }
 0x16e   : > { %v704_v33 = vpop.trf.xlu0  ;;  %1555 = vmatmul.mubr.msk.f32.gmra.mrb[14].mxu1 %vm713_vm4, %v672_v32 }
 0x16f   : > { %922 = vmatprep.mubr.f32.mxu1 %v1873_v12 }
 0x171   : > { %v673_v34 = vpop.trf.xlu1 }
 0x172   : > { %v705_v35 = vpop.trf.xlu0  ;;  %1556 = vmatmul.mubr.msk.f32.gmra.mrb[16].mxu1 %vm713_vm4, %v673_v34 }
 0x173   : > { %928 = vmatprep.mubr.f32.mxu1 %v1873_v12 }
 0x175   : > { %v674_v36 = vpop.trf.xlu1 }
 0x176   : > { %v706_v37 = vpop.trf.xlu0  ;;  %1557 = vmatmul.mubr.msk.f32.gmra.mrb[18].mxu1 %vm713_vm4, %v674_v36 }
 0x177   : > { %934 = vmatprep.mubr.f32.mxu1 %v1873_v12 }
 0x179   : > { %v675_v38 = vpop.trf.xlu1 }
 0x17a   : > { %v707_v39 = vpop.trf.xlu0  ;;  %1558 = vmatmul.mubr.msk.f32.gmra.mrb[20].mxu1 %vm713_vm4, %v675_v38 }
 0x17b   : > { %940 = vmatprep.mubr.f32.mxu1 %v1873_v12 }
 0x17d   : > { %v676_v40 = vpop.trf.xlu1 }
 0x17e   : > { %v708_v41 = vpop.trf.xlu0  ;;  %1559 = vmatmul.mubr.msk.f32.gmra.mrb[22].mxu1 %vm713_vm4, %v676_v40 }
 0x17f   : > { %946 = vmatprep.mubr.f32.mxu1 %v1873_v12 }
 0x181   : > { %v677_v42 = vpop.trf.xlu1 }
 0x182   : > { %v709_v45 = vpop.trf.xlu0  ;;  %1560 = vmatmul.mubr.msk.f32.gmra.mrb[24].mxu1 %vm713_vm4, %v677_v42 }
 0x183   : > { %952 = vmatprep.mubr.f32.mxu1 %v1873_v12 }
 0x185   : > { %v678_v46 = vpop.trf.xlu1 }
 0x186   : > { %v710_v47 = vpop.trf.xlu0  ;;  %1561 = vmatmul.mubr.msk.f32.gmra.mrb[26].mxu1 %vm713_vm4, %v678_v46 }
 0x187   : > { %958 = vmatprep.mubr.f32.mxu1 %v1873_v12 }
 0x189   : > { %v679_v48 = vpop.trf.xlu1 }
 0x18a   : > { %v711_v49 = vpop.trf.xlu0  ;;  %1562 = vmatmul.mubr.msk.f32.gmra.mrb[28].mxu1 %vm713_vm4, %v679_v48 }
 0x18b   : > { %964 = vmatprep.mubr.f32.mxu1 %v1873_v12 }
 0x18d   : > { %v680_v50 = vpop.trf.xlu1 }
 0x18e   : > { %v712_v51 = vpop.trf.xlu0  ;;  %1563 = vmatmul.mubr.msk.f32.gmra.mrb[30].mxu1 %vm713_vm4, %v680_v50 }
 0x18f   : > { %970 = vmatprep.mubr.f32.mxu1 %v1873_v12 }
 0x192   : > { %v531_v7 = vpop.trf.xlu0  ;;  %1564 = vmatmul.mubr.msk.f32.gmra.mrb[32].mxu1 %vm713_vm4, %v2141_v20 }
 0x193   : > { %1546 = vmatmul.mubr.msk.f32.vlgmr.msra.gmra.mrb[0].mxu0 %vm547_vm5, %v531_v7  ;;  %976 = vmatprep.mubr.f32.mxu1 %v1873_v12 }
 0x194   : > { %624 = vmatprep.mubr.f32.mxu0 %v1873_v12 }
 0x196   : > { %v532_v53 = vpop.trf.xlu0  ;;  %1565 = vmatmul.mubr.msk.f32.gmra.mrb[34].mxu1 %vm713_vm4, %v2145_v4 }
 0x197   : > { %1547 = vmatmul.mubr.msk.f32.gmra.mrb[2].mxu0 %vm547_vm5, %v532_v53  ;;  %982 = vmatprep.mubr.f32.mxu1 %v1873_v12 }
 0x19a   : > { %1566 = vmatmul.mubr.msk.f32.gmra.mrb[36].mxu1 %vm713_vm4, %v2149_v23 }
 0x19b   : > { %988 = vmatprep.mubr.f32.mxu1 %v1873_v12 }
 0x19e   : > { %1567 = vmatmul.mubr.msk.f32.gmra.mrb[38].mxu1 %vm713_vm4, %v2153_v25 }
 0x19f   : > { %994 = vmatprep.mubr.f32.mxu1 %v1873_v12 }
 0x1a2   : > { %1568 = vmatmul.mubr.msk.f32.gmra.mrb[40].mxu1 %vm713_vm4, %v701_v27 }
 0x1a3   : > { %1000 = vmatprep.mubr.f32.mxu1 %v1873_v12 }
 0x1a6   : > { %1569 = vmatmul.mubr.msk.f32.gmra.mrb[42].mxu1 %vm713_vm4, %v702_v29 }
 0x1a7   : > { %1006 = vmatprep.mubr.f32.mxu1 %v1873_v12 }
 0x1aa   : > { %1570 = vmatmul.mubr.msk.f32.gmra.mrb[44].mxu1 %vm713_vm4, %v703_v31 }
 0x1ab   : > { %1012 = vmatprep.mubr.f32.mxu1 %v1873_v12 }
 0x1ae   : > { %1571 = vmatmul.mubr.msk.f32.gmra.mrb[46].mxu1 %vm713_vm4, %v704_v33 }
 0x1af   : > { %1018 = vmatprep.mubr.f32.mxu1 %v1873_v12 }
 0x1b2   : > { %1572 = vmatmul.mubr.msk.f32.gmra.mrb[48].mxu1 %vm713_vm4, %v705_v35 }
 0x1b3   : > { %1024 = vmatprep.mubr.f32.mxu1 %v1873_v12 }
 0x1b6   : > { %1573 = vmatmul.mubr.msk.f32.gmra.mrb[50].mxu1 %vm713_vm4, %v706_v37 }
 0x1b7   : > { %1030 = vmatprep.mubr.f32.mxu1 %v1873_v12 }
 0x1ba   : > { %1574 = vmatmul.mubr.msk.f32.gmra.mrb[52].mxu1 %vm713_vm4, %v707_v39 }
 0x1bb   : > { %1036 = vmatprep.mubr.f32.mxu1 %v1873_v12 }
 0x1be   : > { %1575 = vmatmul.mubr.msk.f32.gmra.mrb[54].mxu1 %vm713_vm4, %v708_v41 }
 0x1bf   : > { %1042 = vmatprep.mubr.f32.mxu1 %v1873_v12 }
 0x1c1   : > { %v1083_v54 = vpop.xlane.xlu1 %1082 }
 0x1c2   : > { %1576 = vmatmul.mubr.msk.f32.gmra.mrb[56].mxu1 %vm713_vm4, %v709_v45  ;;  %v1084_v55 = vmul.f32 %v1083_v54, %v2135_v18  ;;  %v1085_v56 = vmul.f32 %v1083_v54, %v2137_v19 }
 0x1c3   : > { %1048 = vmatprep.mubr.f32.mxu1 %v1873_v12 }
 0x1c4   : > { %1663 = vrsqrt.f32 %v1084_v55  ;;  %vm1088_vm6 = vcmp.eq.f32.partialorder %v1084_v55, inf  ;;  %vm1095_vm7 = vcmp.eq.f32.partialorder %v1085_v56, inf  ;;  %v1091_v6 = vand.u32 2147483648, %v1084_v55 }
 0x1c5   : > { %1665 = vrsqrt.f32 %v1085_v56  ;;  %vm1090_vm8 = vcmp.eq.f32.partialorder %v1084_v55, 0.0  ;;  %v1098_v8 = vand.u32 2147483648, %v1085_v56  ;;  %vm1097_vm9 = vcmp.eq.f32.partialorder %v1085_v56, 0.0 }
 0x1c6   : > { %1577 = vmatmul.mubr.msk.f32.gmra.mrb[58].mxu1 %vm713_vm4, %v710_v47 }
 0x1c7   : > { %1054 = vmatprep.mubr.f32.mxu1 %v1873_v12 }
 0x1ca   : > { %1578 = vmatmul.mubr.msk.f32.gmra.mrb[60].mxu1 %vm713_vm4, %v711_v49 }
 0x1cb   : > { %1060 = vmatprep.mubr.f32.mxu1 %v1873_v12 }
 0x1ce   : > { %1579 = vmatmul.mubr.msk.f32.gmra.mrb[62].mxu1 %vm713_vm4, %v712_v51  ;;  %v1664_v59 = vpop.eup %1663 }
 0x1cf   : > { %v1666_v60 = vpop.eup %1665  ;;  %v1087_v62 = vmul.f32 %v1664_v59, %v1084_v55 }
 0x1d0   : > { %v1094_v1 = vmul.f32 %v1666_v60, %v1085_v56 }
 0x1d1   : > { %v1089_v5 = vsel %vm1088_vm6, %v1084_v55, %v1087_v62 }
 0x1d2   : > { %v1096_v12 = vsel %vm1095_vm7, %v1085_v56, %v1094_v1  ;;  %v2219_v9 = vsel %vm1090_vm8, %v1091_v6, %v1089_v5 }
 0x1d3   : > { %v2221_v11 = vsel %vm1097_vm9, %v1098_v8, %v1096_v12 }
 0x225   : > { %v876_v2 = vpop.f32.mrb[0].mxu1 }
 0x226   : > { %v878_v57 = vpop.f32.mrb[1].mxu1  ;;  %v1100_v13 = vsub.f32 %v876_v2, %v2219_v9 }
 0x227   : > { %v1101_v16 = vsub.f32 %v878_v57, %v2221_v11 }
 0x229   : > { %v882_v10 = vpop.f32.mrb[2].mxu1 }
 0x22a   : > { %v1102_v14 = vsub.f32 %v882_v10, %v2219_v9  ;;  %v884_v15 = vpop.f32.mrb[3].mxu1 }
 0x22b   : > { %v1103_v17 = vsub.f32 %v884_v15, %v2221_v11 }
 0x22c   : > { %v1164_v18 = vpack.c.bf16 %v1102_v14, %v1100_v13 }
 0x22d   : > { %v1165_v19 = vpack.c.bf16 %v1103_v17, %v1101_v16  ;;  %v888_v43 = vpop.f32.mrb[4].mxu1 }
 0x22e   : > { %v1197_v44 = vmul.bf16 1069105081, %v1164_v18  ;;  %v890_v20 = vpop.f32.mrb[5].mxu1  ;;  %v1104_v22 = vsub.f32 %v888_v43, %v2219_v9 }
 0x22f   : > { %v1200_v21 = vmul.bf16 1069105081, %v1165_v19  ;;  %v1105_v25 = vsub.f32 %v890_v20, %v2221_v11 }
 0x231   : > { %1667 = vpow.bf16 %v1200_v21  ;;  %v894_v4 = vpop.f32.mrb[6].mxu1 }
 0x232   : > { %1669 = vpow.bf16 %v1197_v44  ;;  %v1106_v23 = vsub.f32 %v894_v4, %v2219_v9  ;;  %v896_v24 = vpop.f32.mrb[7].mxu1 }
 0x233   : > { %v1107_v26 = vsub.f32 %v896_v24, %v2221_v11 }
 0x234   : > { %v1166_v27 = vpack.c.bf16 %v1106_v23, %v1104_v22 }
 0x235   : > { %v1167_v28 = vpack.c.bf16 %v1107_v26, %v1105_v25  ;;  %v900_v29 = vpop.f32.mrb[8].mxu1 }
 0x236   : > { %v1203_v30 = vmul.bf16 1069105081, %v1166_v27  ;;  %v902_v31 = vpop.f32.mrb[9].mxu1  ;;  %v1108_v34 = vsub.f32 %v900_v29, %v2219_v9 }
 0x237   : > { %v1206_v32 = vmul.bf16 1069105081, %v1167_v28  ;;  %v1109_v37 = vsub.f32 %v902_v31, %v2221_v11 }
 0x239   : > { %1671 = vpow.bf16 %v1206_v32  ;;  %v906_v33 = vpop.f32.mrb[10].mxu1 }
 0x23a   : > { %1673 = vpow.bf16 %v1203_v30  ;;  %v1110_v35 = vsub.f32 %v906_v33, %v2219_v9  ;;  %v908_v36 = vpop.f32.mrb[11].mxu1 }
 0x23b   : > { %v1111_v38 = vsub.f32 %v908_v36, %v2221_v11 }
 0x23c   : > { %v1668_v39 = vpop.eup %1667  ;;  %v1168_v40 = vpack.c.bf16 %v1110_v35, %v1108_v34 }
 0x23d   : > { %v1670_v41 = vpop.eup %1669  ;;  %v1169_v42 = vpack.c.bf16 %v1111_v38, %v1109_v37  ;;  %v912_v45 = vpop.f32.mrb[12].mxu1  ;;  %1297 = vmatprep.subr.bf16.mxu0 %v1668_v39 }
 0x23e   : > { %v1209_v46 = vmul.bf16 1069105081, %v1168_v40  ;;  %v914_v47 = vpop.f32.mrb[13].mxu1  ;;  %1298 = vmatpush1.bf16.msra.mxu0 %v1670_v41  ;;  %v1112_v50 = vsub.f32 %v912_v45, %v2219_v9 }
 0x23f   : > { %v1212_v48 = vmul.bf16 1069105081, %v1169_v42  ;;  %v1113_v53 = vsub.f32 %v914_v47, %v2221_v11 }
 0x241   : > { %1675 = vpow.bf16 %v1212_v48  ;;  %v918_v49 = vpop.f32.mrb[14].mxu1 }
 0x242   : > { %1677 = vpow.bf16 %v1209_v46  ;;  %v1114_v51 = vsub.f32 %v918_v49, %v2219_v9  ;;  %v920_v7 = vpop.f32.mrb[15].mxu1 }
 0x243   : > { %v1115_v54 = vsub.f32 %v920_v7, %v2221_v11 }
 0x244   : > { %v1672_v55 = vpop.eup %1671  ;;  %v1170_v56 = vpack.c.bf16 %v1114_v51, %v1112_v50 }
 0x245   : > { %v1674_v59 = vpop.eup %1673  ;;  %v1171_v60 = vpack.c.bf16 %v1115_v54, %v1113_v53  ;;  %v924_v62 = vpop.f32.mrb[16].mxu1  ;;  %1299 = vmatprep.subr.bf16.mxu0 %v1672_v55 }
 0x246   : > { %v1215_v1 = vmul.bf16 1069105081, %v1170_v56  ;;  %v926_v2 = vpop.f32.mrb[17].mxu1  ;;  %1300 = vmatpush1.bf16.msra.mxu0 %v1674_v59  ;;  %v1116_v6 = vsub.f32 %v924_v62, %v2219_v9 }
 0x247   : > { %v1218_v5 = vmul.bf16 1069105081, %v1171_v60  ;;  %v1117_v10 = vsub.f32 %v926_v2, %v2221_v11 }
 0x249   : > { %1679 = vpow.bf16 %v1218_v5  ;;  %v930_v57 = vpop.f32.mrb[18].mxu1 }
 0x24a   : > { %1681 = vpow.bf16 %v1215_v1  ;;  %v1118_v12 = vsub.f32 %v930_v57, %v2219_v9  ;;  %v932_v8 = vpop.f32.mrb[19].mxu1 }
 0x24b   : > { %v1119_v13 = vsub.f32 %v932_v8, %v2221_v11 }
 0x24c   : > { %v1676_v14 = vpop.eup %1675  ;;  %v1172_v15 = vpack.c.bf16 %v1118_v12, %v1116_v6 }
 0x24d   : > { %v1678_v16 = vpop.eup %1677  ;;  %v1173_v17 = vpack.c.bf16 %v1119_v13, %v1117_v10  ;;  %v936_v18 = vpop.f32.mrb[20].mxu1  ;;  %1301 = vmatprep.subr.bf16.mxu0 %v1676_v14 }
 0x24e   : > { %v1221_v19 = vmul.bf16 1069105081, %v1172_v15  ;;  %v938_v43 = vpop.f32.mrb[21].mxu1  ;;  %1302 = vmatpush1.bf16.msra.mxu0 %v1678_v16  ;;  %v1120_v21 = vsub.f32 %v936_v18, %v2219_v9 }
 0x24f   : > { %v1224_v44 = vmul.bf16 1069105081, %v1173_v17  ;;  %v1121_v23 = vsub.f32 %v938_v43, %v2221_v11 }
 0x251   : > { %1683 = vpow.bf16 %v1224_v44  ;;  %v942_v20 = vpop.f32.mrb[22].mxu1 }
 0x252   : > { %1685 = vpow.bf16 %v1221_v19  ;;  %v1122_v4 = vsub.f32 %v942_v20, %v2219_v9  ;;  %v944_v22 = vpop.f32.mrb[23].mxu1 }
 0x253   : > { %v1123_v24 = vsub.f32 %v944_v22, %v2221_v11 }
 0x254   : > { %v1680_v25 = vpop.eup %1679  ;;  %v1174_v26 = vpack.c.bf16 %v1122_v4, %v1120_v21 }
 0x255   : > { %v1682_v27 = vpop.eup %1681  ;;  %v1175_v28 = vpack.c.bf16 %v1123_v24, %v1121_v23  ;;  %v948_v29 = vpop.f32.mrb[24].mxu1  ;;  %1303 = vmatprep.subr.bf16.mxu0 %v1680_v25 }
 0x256   : > { %v1227_v30 = vmul.bf16 1069105081, %v1174_v26  ;;  %v950_v31 = vpop.f32.mrb[25].mxu1  ;;  %1304 = vmatpush1.bf16.msra.mxu0 %v1682_v27  ;;  %v1124_v34 = vsub.f32 %v948_v29, %v2219_v9 }
 0x257   : > { %v1230_v32 = vmul.bf16 1069105081, %v1175_v28  ;;  %v1125_v37 = vsub.f32 %v950_v31, %v2221_v11 }
 0x259   : > { %1687 = vpow.bf16 %v1230_v32  ;;  %v954_v33 = vpop.f32.mrb[26].mxu1 }
 0x25a   : > { %1689 = vpow.bf16 %v1227_v30  ;;  %v1126_v35 = vsub.f32 %v954_v33, %v2219_v9  ;;  %v956_v36 = vpop.f32.mrb[27].mxu1 }
 0x25b   : > { %v1127_v38 = vsub.f32 %v956_v36, %v2221_v11 }
 0x25c   : > { %v1684_v39 = vpop.eup %1683  ;;  %v1176_v40 = vpack.c.bf16 %v1126_v35, %v1124_v34 }
 0x25d   : > { %v1686_v41 = vpop.eup %1685  ;;  %v1177_v42 = vpack.c.bf16 %v1127_v38, %v1125_v37  ;;  %v960_v45 = vpop.f32.mrb[28].mxu1  ;;  %1305 = vmatprep.subr.bf16.mxu0 %v1684_v39 }
 0x25e   : > { %v1233_v46 = vmul.bf16 1069105081, %v1176_v40  ;;  %v962_v47 = vpop.f32.mrb[29].mxu1  ;;  %1306 = vmatpush1.bf16.msra.mxu0 %v1686_v41  ;;  %v1128_v50 = vsub.f32 %v960_v45, %v2219_v9 }
 0x25f   : > { %v1236_v48 = vmul.bf16 1069105081, %v1177_v42  ;;  %v1129_v53 = vsub.f32 %v962_v47, %v2221_v11 }
 0x261   : > { %1691 = vpow.bf16 %v1236_v48  ;;  %v966_v49 = vpop.f32.mrb[30].mxu1 }
 0x262   : > { %1693 = vpow.bf16 %v1233_v46  ;;  %v1130_v51 = vsub.f32 %v966_v49, %v2219_v9  ;;  %v968_v7 = vpop.f32.mrb[31].mxu1 }
 0x263   : > { %v1131_v54 = vsub.f32 %v968_v7, %v2221_v11 }
 0x264   : > { %v1688_v55 = vpop.eup %1687  ;;  %v1178_v56 = vpack.c.bf16 %v1130_v51, %v1128_v50 }
 0x265   : > { %v1690_v59 = vpop.eup %1689  ;;  %v1179_v60 = vpack.c.bf16 %v1131_v54, %v1129_v53  ;;  %v972_v62 = vpop.f32.mrb[32].mxu1  ;;  %1307 = vmatprep.subr.bf16.mxu0 %v1688_v55 }
 0x266   : > { %v1239_v1 = vmul.bf16 1069105081, %v1178_v56  ;;  %v620_v2 = vpop.f32.mrb[0].mxu0  ;;  %v974_v5 = vpop.f32.mrb[33].mxu1  ;;  %1308 = vmatpush1.bf16.msra.mxu0 %v1690_v59  ;;  %v1132_v13 = vsub.f32 %v972_v62, %v2219_v9 }
 0x267   : > { %v1242_v57 = vmul.bf16 1069105081, %v1179_v60  ;;  %v631_v6 = vmul.f32 %v620_v2, %v2116_v52  ;;  %v622_v12 = vpop.f32.mrb[1].mxu0  ;;  %v1133_v17 = vsub.f32 %v974_v5, %v2221_v11 }
 0x268   : > { %v632_v8 = vmul.f32 %v622_v12, %v2122_v58 }
 0x269   : > { %1695 = vpow.bf16 %v1242_v57  ;;  %v978_v10 = vpop.f32.mrb[34].mxu1 }
 0x26a   : > { %1697 = vpow.bf16 %v1239_v1  ;;  %v1134_v14 = vsub.f32 %v978_v10, %v2219_v9  ;;  %v626_v15 = vpop.f32.mrb[2].mxu0  ;;  %v980_v16 = vpop.f32.mrb[35].mxu1 }
 0x26b   : > { %v633_v18 = vmul.f32 %v626_v15, %v2125_v61  ;;  %v1135_v19 = vsub.f32 %v980_v16, %v2221_v11  ;;  %v628_v43 = vpop.f32.mrb[3].mxu0 }
 0x26c   : > { %v1692_v52 = vpop.eup %1691  ;;  %v1180_v44 = vpack.c.bf16 %v1134_v14, %v1132_v13  ;;  %v634_v58 = vmul.f32 %v628_v43, %v2127_v63 }
 0x26d   : > { %v1694_v20 = vpop.eup %1693  ;;  %v2263_v21 = vadd.f32 %v633_v18, %v631_v6  ;;  %v1181_v4 = vpack.c.bf16 %v1135_v19, %v1133_v17  ;;  %v984_v22 = vpop.f32.mrb[36].mxu1  ;;  %1309 = vmatprep.subr.bf16.mxu0 %v1692_v52 }
 0x26e   : > { %v1245_v23 = vmul.bf16 1069105081, %v1180_v44  ;;  %v642_v24 = vadd.f32 %v634_v58, %v632_v8  ;;  %v986_v25 = vpop.f32.mrb[37].mxu1  ;;  %1310 = vmatpush1.bf16.msra.mxu0 %v1694_v20  ;;  %v1136_v29 = vsub.f32 %v984_v22, %v2219_v9 }
 0x26f   : > { %v1248_v26 = vmul.bf16 1069105081, %v1181_v4  ;;  %v1137_v31 = vsub.f32 %v986_v25, %v2221_v11 }
 0x270   : > { %v643_v27 = vrot.slane %v642_v24, 4 }
 0x271   : > { %1699 = vpow.bf16 %v1248_v26  ;;  %v990_v61 = vpop.f32.mrb[38].mxu1 }
 0x272   : > { %1701 = vpow.bf16 %v1245_v23  ;;  %v644_v28 = vadd.f32 %v643_v27, %v642_v24  ;;  %v1138_v63 = vsub.f32 %v990_v61, %v2219_v9  ;;  %v992_v30 = vpop.f32.mrb[39].mxu1 }
 0x273   : > { %v1139_v32 = vsub.f32 %v992_v30, %v2221_v11 }
 0x274   : > { %v1696_v33 = vpop.eup %1695  ;;  %v645_v34 = vrot.slane %v644_v28, 2  ;;  %v1182_v35 = vpack.c.bf16 %v1138_v63, %v1136_v29 }
 0x275   : > { %v1698_v36 = vpop.eup %1697  ;;  %v1183_v37 = vpack.c.bf16 %v1139_v32, %v1137_v31  ;;  %v996_v38 = vpop.f32.mrb[40].mxu1  ;;  %1311 = vmatprep.subr.bf16.mxu0 %v1696_v33 }
 0x276   : > { %v646_v39 = vadd.f32 %v645_v34, %v644_v28  ;;  %v1251_v40 = vmul.bf16 1069105081, %v1182_v35  ;;  %v998_v41 = vpop.f32.mrb[41].mxu1  ;;  %1312 = vmatpush1.bf16.msra.mxu0 %v1698_v36  ;;  %v1140_v47 = vsub.f32 %v996_v38, %v2219_v9 }
 0x277   : > { %v1254_v42 = vmul.bf16 1069105081, %v1183_v37  ;;  %v1141_v51 = vsub.f32 %v998_v41, %v2221_v11 }
 0x278   : > { %v647_v45 = vrot.slane %v646_v39, 1 }
 0x279   : > { %1703 = vpow.bf16 %v1254_v42  ;;  %v1002_v46 = vpop.f32.mrb[42].mxu1 }
 0x27a   : > { %1705 = vpow.bf16 %v1251_v40  ;;  %v1142_v48 = vsub.f32 %v1002_v46, %v2219_v9  ;;  %v1004_v49 = vpop.f32.mrb[43].mxu1  ;;  %v648_v50 = vadd.f32 %v647_v45, %v646_v39 }
 0x27b   : > { %v1143_v7 = vsub.f32 %v1004_v49, %v2221_v11 }
 0x27c   : > { %v1700_v53 = vpop.eup %1699  ;;  %v1184_v54 = vpack.c.bf16 %v1142_v48, %v1140_v47  ;;  %v1294_v55 = vsel %vm1292_vm10, %v648_v50, 1.0 }
 0x27d   : > { %v1702_v56 = vpop.eup %1701  ;;  %v1185_v59 = vpack.c.bf16 %v1143_v7, %v1141_v51  ;;  %v1008_v60 = vpop.f32.mrb[44].mxu1  ;;  %1313 = vmatprep.subr.bf16.mxu0 %v1700_v53  ;;  %v1296_v62 = vpack.c.bf16 %v1294_v55, %v1294_v55  ;;  %v636_v53 = vrot.slane %v2263_v21, 4 }
 0x27e   : > { %v1257_v1 = vmul.bf16 1069105081, %v1184_v54  ;;  %v1010_v2 = vpop.f32.mrb[45].mxu1  ;;  %1314 = vmatpush1.bf16.msra.mxu0 %v1702_v56  ;;  %v1144_v6 = vsub.f32 %v1008_v60, %v2219_v9 }
 0x27f   : > { %v1260_v5 = vmul.bf16 1069105081, %v1185_v59  ;;  %1329 = vmatprep.mubr.bf16.mxu0 %v1296_v62  ;;  %v1145_v10 = vsub.f32 %v1010_v2, %v2221_v11  ;;  %v637_v2 = vadd.f32 %v636_v53, %v2263_v21 }
 0x281   : > { %1707 = vpow.bf16 %v1260_v5  ;;  %v1014_v57 = vpop.f32.mrb[46].mxu1 }
 0x282   : > { %1709 = vpow.bf16 %v1257_v1  ;;  %v1146_v12 = vsub.f32 %v1014_v57, %v2219_v9  ;;  %v1016_v8 = vpop.f32.mrb[47].mxu1 }
 0x283   : > { %v1147_v13 = vsub.f32 %v1016_v8, %v2221_v11 }
 0x284   : > { %v1704_v14 = vpop.eup %1703  ;;  %v1186_v15 = vpack.c.bf16 %v1146_v12, %v1144_v6 }
 0x285   : > { %v1706_v16 = vpop.eup %1705  ;;  %v1187_v17 = vpack.c.bf16 %v1147_v13, %v1145_v10  ;;  %v1020_v18 = vpop.f32.mrb[48].mxu1  ;;  %1315 = vmatprep.subr.bf16.mxu0 %v1704_v14  ;;  %v638_v14 = vrot.slane %v637_v2, 2 }
 0x286   : > { %v1263_v19 = vmul.bf16 1069105081, %v1186_v15  ;;  %v1022_v43 = vpop.f32.mrb[49].mxu1  ;;  %1316 = vmatpush1.bf16.msra.mxu0 %v1706_v16  ;;  %v1148_v58 = vsub.f32 %v1020_v18, %v2219_v9 }
 0x287   : > { %v1266_v52 = vmul.bf16 1069105081, %v1187_v17  ;;  %v1149_v22 = vsub.f32 %v1022_v43, %v2221_v11 }
 0x289   : > { %1711 = vpow.bf16 %v1266_v52  ;;  %v1026_v44 = vpop.f32.mrb[50].mxu1 }
 0x28a   : > { %1713 = vpow.bf16 %v1263_v19  ;;  %v1150_v20 = vsub.f32 %v1026_v44, %v2219_v9  ;;  %v1028_v4 = vpop.f32.mrb[51].mxu1  ;;  %v639_v19 = vadd.f32 %v638_v14, %v637_v2 }
 0x28b   : > { %v1151_v23 = vsub.f32 %v1028_v4, %v2221_v11 }
 0x28c   : > { %v1708_v24 = vpop.eup %1707  ;;  %v1188_v25 = vpack.c.bf16 %v1150_v20, %v1148_v58  ;;  %v640_v43 = vrot.slane %v639_v19, 1 }
 0x28d   : > { %v1710_v26 = vpop.eup %1709  ;;  %v1189_v27 = vpack.c.bf16 %v1151_v23, %v1149_v22  ;;  %v1032_v61 = vpop.f32.mrb[52].mxu1  ;;  %1317 = vmatprep.subr.bf16.mxu0 %v1708_v24 }
 0x28e   : > { %v1269_v28 = vmul.bf16 1069105081, %v1188_v25  ;;  %v1034_v29 = vpop.f32.mrb[53].mxu1  ;;  %1318 = vmatpush1.bf16.msra.mxu0 %v1710_v26  ;;  %v1152_v31 = vsub.f32 %v1032_v61, %v2219_v9 }
 0x28f   : > { %v1272_v63 = vmul.bf16 1069105081, %v1189_v27  ;;  %v1153_v34 = vsub.f32 %v1034_v29, %v2221_v11 }
 0x291   : > { %1715 = vpow.bf16 %v1272_v63  ;;  %v1038_v30 = vpop.f32.mrb[54].mxu1 }
 0x292   : > { %1717 = vpow.bf16 %v1269_v28  ;;  %v1154_v32 = vsub.f32 %v1038_v30, %v2219_v9  ;;  %v1040_v33 = vpop.f32.mrb[55].mxu1 }
 0x293   : > { %v1155_v35 = vsub.f32 %v1040_v33, %v2221_v11 }
 0x294   : > { %v1712_v36 = vpop.eup %1711  ;;  %v1190_v37 = vpack.c.bf16 %v1154_v32, %v1152_v31 }
 0x295   : > { %v1714_v38 = vpop.eup %1713  ;;  %v1191_v39 = vpack.c.bf16 %v1155_v35, %v1153_v34  ;;  %v1044_v40 = vpop.f32.mrb[56].mxu1  ;;  %1319 = vmatprep.subr.bf16.mxu0 %v1712_v36 }
 0x296   : > { %v1275_v41 = vmul.bf16 1069105081, %v1190_v37  ;;  %v1046_v42 = vpop.f32.mrb[57].mxu1  ;;  %1320 = vmatpush1.bf16.msra.mxu0 %v1714_v38  ;;  %v1156_v47 = vsub.f32 %v1044_v40, %v2219_v9 }
 0x297   : > { %v1278_v45 = vmul.bf16 1069105081, %v1191_v39  ;;  %v1157_v50 = vsub.f32 %v1046_v42, %v2221_v11 }
 0x299   : > { %1719 = vpow.bf16 %v1278_v45  ;;  %v1050_v46 = vpop.f32.mrb[58].mxu1 }
 0x29a   : > { %1721 = vpow.bf16 %v1275_v41  ;;  %v1158_v48 = vsub.f32 %v1050_v46, %v2219_v9  ;;  %v1052_v49 = vpop.f32.mrb[59].mxu1 }
 0x29b   : > { %v1159_v51 = vsub.f32 %v1052_v49, %v2221_v11 }
 0x29c   : > { %v1716_v7 = vpop.eup %1715  ;;  %v1192_v54 = vpack.c.bf16 %v1158_v48, %v1156_v47 }
 0x29d   : > { %v1718_v55 = vpop.eup %1717  ;;  %v1193_v56 = vpack.c.bf16 %v1159_v51, %v1157_v50  ;;  %v1056_v59 = vpop.f32.mrb[60].mxu1  ;;  %1321 = vmatprep.subr.bf16.mxu0 %v1716_v7 }
 0x29e   : > { %v1281_v60 = vmul.bf16 1069105081, %v1192_v54  ;;  %v1058_v62 = vpop.f32.mrb[61].mxu1  ;;  %1322 = vmatpush1.bf16.msra.mxu0 %v1718_v55  ;;  %v1160_v57 = vsub.f32 %v1056_v59, %v2219_v9 }
 0x29f   : > { %v1284_v1 = vmul.bf16 1069105081, %v1193_v56  ;;  %v1161_v8 = vsub.f32 %v1058_v62, %v2221_v11 }
 0x2a1   : > { %1723 = vpow.bf16 %v1284_v1  ;;  %v1062_v5 = vpop.f32.mrb[62].mxu1 }
 0x2a2   : > { %1725 = vpow.bf16 %v1281_v60  ;;  %v1162_v6 = vsub.f32 %v1062_v5, %v2219_v9  ;;  %v1064_v12 = vpop.f32.mrb[63].mxu1 }
 0x2a3   : > { %v1163_v10 = vsub.f32 %v1064_v12, %v2221_v11  ;;  %v641_v11 = vadd.f32 %v640_v43, %v639_v19 }
 0x2a4   : > { %v1720_v13 = vpop.eup %1719  ;;  %v1194_v15 = vpack.c.bf16 %v1162_v6, %v1160_v57 }
 0x2a5   : > { %v1722_v16 = vpop.eup %1721  ;;  %v1195_v17 = vpack.c.bf16 %v1163_v10, %v1161_v8  ;;  %1323 = vmatprep.subr.bf16.mxu0 %v1720_v13  ;;  %v1293_v58 = vsel %vm1292_vm10, %v641_v11, 1.0 }
 0x2a6   : > { %v1287_v18 = vmul.bf16 1069105081, %v1194_v15  ;;  %1324 = vmatpush1.bf16.msra.mxu0 %v1722_v16  ;;  %v1295_v4 = vpack.c.bf16 %v1293_v58, %v1293_v58 }
 0x2a7   : > { %v1290_v21 = vmul.bf16 1069105081, %v1195_v17 }
 0x2a9   : > { %1727 = vpow.bf16 %v1290_v21 }
 0x2aa   : > { %1729 = vpow.bf16 %v1287_v18 }
 0x2ac   : > { %v1724_v9 = vpop.eup %1723 }
 0x2ad   : > { %v1726_v52 = vpop.eup %1725  ;;  %1325 = vmatprep.subr.bf16.mxu0 %v1724_v9 }
 0x2ae   : > { %1326 = vmatpush1.bf16.msra.mxu0 %v1726_v52 }
 0x2b4   : > { %v1728_v44 = vpop.eup %1727 }
 0x2b5   : > { %v1730_v20 = vpop.eup %1729  ;;  %1327 = vmatprep.subr.bf16.mxu0 %v1728_v44 }
 0x2b6   : > { %1328 = vmatpush1.bf16.msra.mxu0 %v1730_v20 }
 0x2b9   : > { %1330 = vmatmul.mubr.bf16.vlgmr.msra.gmra.mrb[4].mxu0 %v1295_v4 }
 0x2ba   : > { %1778 = shalt.err (!%p1775_p4)
}
 0x2bb   : > { %s1779_s9 = scalar_lea.hbm %s2302_s14, 256  ;;  %s1783_s13 = scalar_lea.hbm %s2378_s5, 512 }
 0x2bc   : > { %p1780_p5 = scmp.ne.s32.totalorder %s2302_s14, %s1779_s9  ;;  %p1784_p1 = scmp.lt.u32.totalorder %s2302_s14, %s2378_s5 }
 0x2bd   : > { %p1785_p3 = scmp.lt.u32.totalorder %s1783_s13, %s1779_s9  ;;  %p1787_p6 = scmp.lt.u32.totalorder %s1779_s9, %s2302_s14 }
 0x2be   : > { %p1781_p7 = pnand %p1780_p5, %p2385_p12 }
 0x2bf   : > { %p1786_p11 = por %p1785_p3, %p1784_p1 }
 0x2c0   : > { %p1782_p9 = pneg %p1781_p7 }
 0x2c1   : > { %p1788_p13 = por %p1787_p6, %p1786_p11 }
 0x2c3   : > { %p1789_p8 = pnand %p1788_p13, %p1782_p9 }
 0x2c5   : > { %1792 = shalt.err (!%p1789_p8)
}
 0x2c6   : > { %1602 = dma.vmem_to_hbm [thread:$0]  (%p2385_p12), %s1406_s26, 256, %s2302_s14, %s1377_s15   ;;  %v1875_v26 = vmov 1966171168   ;;  %vm1368_vm11 = vcmp.lt.s32.totalorder %v276_v0, 256 }
 0x2c7   : > { %v1352_v27 = vunpack.c.l.s4 %v1875_v26  ;;  %s1527_s28 = sshll.u32 %s2011_s23, 1  ;;  %s1589_s26 = sshll.u32 %s1928_s22, 5 }
 0x2c8   : > { %s259_s12 = scalar_lea.vmem [#allocation5], %s1527_s28  ;;  %s2329_s8 = scalar_lea.hbm %s2377_s4, %s1589_s26 }
 0x2c9   : > { %v1353_v28 = vunpack.c.0.s8 %v1352_v27  ;;  %s1391_s14 = sshll.u32 %s259_s12, 4  ;;  %s1372_s29 = scalar_lea.sflag [#allocation4], %s2011_s23  ;;  %s2331_s14 = int_to_ptr.vmem [resolvable:$true] %s1391_s14 }
 0x2ca   : > { %s1793_s7 = scalar_lea.vmem %s2331_s14, 32  ;;  %s1876_s22 = smov [#allocation5]  }
 0x2cb   : > { %v1356_v33 = vsub.s32 %v1353_v28, %v2026_v3  ;;  %p1794_p10 = scmp.ne.s32.totalorder %s2331_s14, %s1793_s7  ;;  %s1797_s9 = sshll.u32 %s1876_s22, 4  ;;  %s1798_s9 = int_to_ptr.vmem [resolvable:$false] %s1797_s9 }
 0x2cc   : > { %s1799_s10 = scalar_lea.vmem %s1798_s9, 64  ;;  %p1800_p4 = scmp.lt.s32.totalorder %s2331_s14, %s1798_s9 }
 0x2cd   : > { %p1795_p0 = pnand %p1794_p10, %p2385_p12  ;;  %p1801_p5 = scmp.lt.s32.totalorder %s1799_s10, %s1793_s7 }
 0x2cf   : > { %p1796_p2 = pneg %p1795_p0  ;;  %p1802_p7 = por %p1801_p5, %p1800_p4 }
 0x2d1   : > { %p1803_p9 = pnand %p1802_p7, %p1796_p2 }
 0x38c   : > { %v1331_v22 = vpop.f32.mrb[4].mxu0 }
 0x38d   : > { %1731 = vrcp.f32 %v1331_v22  ;;  %v1333_v23 = vpop.f32.mrb[5].mxu0 }
 0x38e   : > { %1733 = vrcp.f32 %v1333_v23  ;;  %v1335_v24 = vpop.f32.mrb[6].mxu0 }
 0x38f   : > { %v1336_v25 = vpop.f32.mrb[7].mxu0 }
 0x397   : > { %v1732_v61 = vpop.eup %1731 }
 0x398   : > { %v1734_v29 = vpop.eup %1733  ;;  %v1342_v63 = vrot.slane %v1732_v61, 1 }
 0x399   : > { %v1343_v30 = vrot.slane %v1734_v29, 1 }
 0x39a   : > { %v1346_v31 = vmul.f32 %v1342_v63, %v1331_v22 }
 0x39b   : > { %v1347_v32 = vmul.f32 %v1343_v30, %v1333_v23 }
 0x39d   : > { %v1350_v34 = vcombine.low %v1346_v31, %v1347_v32 }
 0x39f   : > { %v1357_v35 = vrot.slane %v1350_v34, %v1356_v33 }
 0x3a1   : > { %v1364_v36 = vrot.slane %v1357_v35, %v1356_v33 }
 0x3a3   : > { %1370 = vst.msk [vmem:[%s259_s12] sm:$0x3] %vm1368_vm11, %v1364_v36 }
 0x3a4   : > { %1806 = shalt.err (!%p1803_p9)
}
 0x3a5   : > { %s1807_s23 = scalar_lea.hbm %s2329_s8, 32  ;;  %s1811_s17 = scalar_lea.hbm %s2377_s4, 64 }
 0x3a6   : > { %p1808_p1 = scmp.ne.s32.totalorder %s2329_s8, %s1807_s23  ;;  %p1812_p6 = scmp.lt.u32.totalorder %s2329_s8, %s2377_s4 }
 0x3a7   : > { %p1813_p13 = scmp.lt.u32.totalorder %s1811_s17, %s1807_s23  ;;  %p1815_p10 = scmp.lt.u32.totalorder %s1807_s23, %s2329_s8 }
 0x3a8   : > { %p1809_p3 = pnand %p1808_p1, %p2385_p12 }
 0x3a9   : > { %p1814_p8 = por %p1813_p13, %p1812_p6 }
 0x3aa   : > { %p1810_p11 = pneg %p1809_p3 }
 0x3ab   : > { %p1816_p0 = por %p1815_p10, %p1814_p8 }
 0x3ad   : > { %p1817_p2 = pnand %p1816_p0, %p1810_p11 }
 0x3af   : > { %1820 = shalt.err (!%p1817_p2)
}
 0x3b0   : > { %1601 = dma.vmem_to_hbm [thread:$0]  (%p2385_p12), %s2331_s14, 32, %s2329_s8, %s1372_s29  }
 0x3b1 PF: > { %s1417_s26 = sand.u32 1, %s1851_s18   ;;  %p2386_p4 = scmp.ne.s32.totalorder %s2383_s6, 0 }
 0x3b2   : > { %p2387_p5 = scmp.ge.s32.totalorder %s1863_s21, 2  ;;  %s1418_s12 = scalar_lea.sflag [#allocation4], %s1417_s26 }
 0x3b4   : > { %p1610_p7 = pnand %p2387_p5, %p2386_p4 }
 0x3b6   : > { %1842 = dma.done.wait (!%p1610_p7), %s1418_s12, 32  }
 0x3b7   : > { %1844 = vsyncadd (!%p1610_p7), %s1418_s12, 4294967264  ;;  %s1427_s15 = scalar_lea.sflag [#allocation7], %s1417_s26 }
 0x3b8   : > { %1846 = dma.done.wait (!%p1610_p7), %s1427_s15, 256  }
 0x3b9   : > { %1848 = vsyncadd (!%p1610_p7), %s1427_s15, 4294967040  ;;  %p22_p12 = scmp.ge.s32.totalorder %s1932_s24, 4   ;;  %s2388_s18 = smov %s1855_s19 }
 0x3ba   : > { %s2389_s19 = smov %s1859_s20  ;;  %s2390_s20 = smov %s1944_s27 }
 0x3bb   : > { %s2391_s21 = smov %s1932_s24  ;;  %24 = sbr.rel (!%p22_p12) target bundleno = 7 (0x7), region = 101 }
 0x3c2   :  { %1432 = vsyncpa [#allocation3], 1 }
 0x3c3   :  { %1434 = vsyncpa [#allocation3 + $0x1], 1 }
 0x3c4   :  { %1435 = vsyncpa [#allocation4], 1 }
 0x3c5   :  { %1437 = vsyncpa [#allocation4 + $0x1], 1 }
 0x3c6   :  { %1438 = vsyncpa [#allocation7], 1 }
 0x3c7   :  { %1440 = vsyncpa [#allocation7 + $0x1], 1 }

</bundles_post_ra>
